<compile_context>
chip_gen: v5e
topology: v5e:2x2
jax: 0.10.0
libtpu: 0.0.40
codegen_flags: <defaults>
</compile_context>

<pallas_src>
import functools

import numpy as np
import jax
import jax.numpy as jnp
from jax import lax
from jax.experimental import pallas as pl
from jax.experimental.pallas import tpu as pltpu

NEG_SLOPE = 0.01   # F.leaky_relu default negative_slope
BN_EPS = 1e-5      # nn.BatchNorm2d default eps


def _round_up(x, m):
    return ((x + m - 1) // m) * m


def _valid_mask(length, img_size, row_w, h_valid, w_valid, n_img):
    """0/1 mask over the flattened padded grid marking genuine conv outputs."""
    i = np.arange(length)
    img = i // img_size
    rem = i % img_size
    hh = rem // row_w
    ww = rem % row_w
    ok = (img < n_img) & (hh < h_valid) & (ww < w_valid)
    return ok.astype(np.float32).reshape(1, length)


@functools.partial(jax.jit, static_argnames=("kernel_size", "padding",
                                             "dilation"))
def conv_processing_block_bn_forward(x_nchw, params, *, kernel_size, padding,
                                     dilation):
    """Full ConvProcessingBlockBNNetwork forward. x_nchw: [N, C, H, W]."""
    n, c_in, h_in, w_in = x_nchw.shape
    f = params["w0"].shape[0]
    k, p, d = kernel_size, padding, dilation

    cp = _round_up(c_in, 8)                             # sublane-aligned C_in
    fp = _round_up(f, 8)                                # sublane-aligned F

    # ------------------------- static geometry -----------------------------
    hp0, wp0 = h_in + 2 * p, w_in + 2 * p               # padded input grid
    h_out1, w_out1 = hp0 - d * (k - 1), wp0 - d * (k - 1)
    s0, t0 = hp0 * wp0, n * hp0 * wp0
    max_off0 = d * (k - 1) * (wp0 + 1)
    l0 = t0 - max_off0                                   # conv0 compute width
    l0_pad = _round_up(l0, 128)                          # lane-dense width
    t0_pad = max_off0 + l0_pad                           # padded input lanes

    hp1, wp1 = h_out1 + 2 * p, w_out1 + 2 * p            # padded grid for conv1
    h_out2, w_out2 = hp1 - d * (k - 1), wp1 - d * (k - 1)
    s1, t1 = hp1 * wp1, n * hp1 * wp1
    max_off1 = d * (k - 1) * (wp1 + 1)
    l1 = t1 - max_off1
    l1_out = _round_up(l1, 128)                          # lane-dense out width

    same_grid = (hp1 == hp0) and (wp1 == wp0)            # "same"-style conv
    shift = p * wp1 + p
    t1_alloc = max(t1, max_off1 + l1_out)
    if same_grid:
        t1_alloc = max(t1_alloc, shift + l0_pad)

    m1_cnt = n * h_out1 * w_out1
    m2_cnt = n * h_out2 * w_out2
    inv_m1, inv_m2 = 1.0 / m1_cnt, 1.0 / m2_cnt

    # ------------- wrapper-side layout plumbing (raw-sized, cheap) ----------
    xp = jnp.pad(jnp.transpose(x_nchw, (1, 0, 2, 3)).astype(jnp.float32),
                 ((0, cp - c_in), (0, 0), (p, p), (p, p)))
    xp_flat = jnp.pad(xp.reshape(cp, t0), ((0, 0), (0, t0_pad - t0)))

    # PyTorch conv weight [F, Cin, kh, kw] -> stacked [Fp, k*k*Cp] whose
    # column layout (tap-major, channel-minor) matches the in-kernel stack.
    w0 = jnp.pad(params["w0"].astype(jnp.float32),
                 ((0, fp - f), (0, cp - c_in), (0, 0), (0, 0)))
    w0s = jnp.transpose(w0, (0, 2, 3, 1)).reshape(fp, k * k * cp)
    w1 = jnp.pad(params["w1"].astype(jnp.float32),
                 ((0, fp - f), (0, fp - f), (0, 0), (0, 0)))
    w1s = jnp.transpose(w1, (0, 2, 3, 1)).reshape(fp, k * k * fp)

    def _col(v):
        return jnp.pad(v.astype(jnp.float32), (0, fp - f)).reshape(fp, 1)

    b0, b1 = _col(params["b0"]), _col(params["b1"])
    g1, be1 = _col(params["g1"]), _col(params["be1"])
    g2, be2 = _col(params["g2"]), _col(params["be2"])

    mask0 = jnp.asarray(_valid_mask(l0_pad, s0, wp0, h_out1, w_out1, n))
    mask1 = jnp.asarray(_valid_mask(l1_out, s1, wp1, h_out2, w_out2, n))

    # ------------------------------ kernel ----------------------------------
    def kernel(xp_ref, m0_ref, m1_ref,
               w0_ref, b0_ref, g1_ref, be1_ref,
               w1_ref, b1_ref, g2_ref, be2_ref,
               o_ref, stk0_ref, y1p_ref, stk1_ref):
        # ---- conv_0: stack k*k shifted lane slices, then ONE MXU matmul ----
        for kh in range(k):
            for kw in range(k):
                off = (kh * wp0 + kw) * d
                tap = kh * k + kw
                stk0_ref[tap * cp:(tap + 1) * cp, :] = \
                    xp_ref[:, off:off + l0_pad]
        x0 = jnp.dot(w0_ref[...], stk0_ref[...],
                     preferred_element_type=jnp.float32) + b0_ref[...]
        x0 = jnp.where(x0 >= 0.0, x0, NEG_SLOPE * x0)        # leaky_relu

        m0 = m0_ref[...]
        mean0 = jnp.sum(x0 * m0, axis=1, keepdims=True) * inv_m1
        cent0 = (x0 - mean0) * m0
        var0 = jnp.sum(cent0 * cent0, axis=1, keepdims=True) * inv_m1
        scale0 = lax.rsqrt(var0 + BN_EPS) * g1_ref[...]
        shift0 = be1_ref[...] - mean0 * scale0
        y1 = x0 * scale0 + shift0                            # BN1 (folded FMA)

        # ---- place BN1 output into a zero-padded VMEM image for conv_1 ----
        y1p_ref[...] = jnp.zeros(y1p_ref.shape, y1p_ref.dtype)
        if same_grid:
            # Padded grids coincide: single masked, lane-shifted block store.
            y1p_ref[:, shift:shift + l0_pad] = y1 * m0
        else:
            # General case: copy each valid output row into the padded grid.
            for ni in range(n):
                for hi in range(h_out1):
                    src = ni * s0 + hi * wp0
                    dst = ni * s1 + (hi + p) * wp1 + p
                    y1p_ref[:, dst:dst + w_out1] = y1[:, src:src + w_out1]

        # ---- conv_1 (VMEM only): stack + ONE matmul -> leaky_relu -> BN2 ----
        for kh in range(k):
            for kw in range(k):
                off = (kh * wp1 + kw) * d
                tap = kh * k + kw
                stk1_ref[tap * fp:(tap + 1) * fp, :] = \
                    y1p_ref[:, off:off + l1_out]
        x1 = jnp.dot(w1_ref[...], stk1_ref[...],
                     preferred_element_type=jnp.float32) + b1_ref[...]
        x1 = jnp.where(x1 >= 0.0, x1, NEG_SLOPE * x1)        # leaky_relu

        m1 = m1_ref[...]
        mean1 = jnp.sum(x1 * m1, axis=1, keepdims=True) * inv_m2
        cent1 = (x1 - mean1) * m1
        var1 = jnp.sum(cent1 * cent1, axis=1, keepdims=True) * inv_m2
        scale1 = lax.rsqrt(var1 + BN_EPS) * g2_ref[...]
        shift1 = be2_ref[...] - mean1 * scale1
        o_ref[...] = (x1 * scale1 + shift1).astype(o_ref.dtype)  # lane-dense

    full2 = lambda i: (0, 0)
    # TODO(synk): for large N*H*W, tile the flat-spatial axis (parallel grid
    # dim + two-phase sum/sumsq BN) instead of keeping the whole problem
    # VMEM-resident; at this module's size a single fused invocation is fastest.
    out = pl.pallas_call(
        kernel,
        out_shape=jax.ShapeDtypeStruct((fp, l1_out), jnp.float32),
        grid=(1,),
        in_specs=[
            pl.BlockSpec((cp, t0_pad), full2),
            pl.BlockSpec((1, l0_pad), full2),
            pl.BlockSpec((1, l1_out), full2),
            pl.BlockSpec((fp, k * k * cp), full2),
            pl.BlockSpec((fp, 1), full2),
            pl.BlockSpec((fp, 1), full2),
            pl.BlockSpec((fp, 1), full2),
            pl.BlockSpec((fp, k * k * fp), full2),
            pl.BlockSpec((fp, 1), full2),
            pl.BlockSpec((fp, 1), full2),
            pl.BlockSpec((fp, 1), full2),
        ],
        out_specs=pl.BlockSpec((fp, l1_out), full2),
        scratch_shapes=[
            pltpu.VMEM((k * k * cp, l0_pad), jnp.float32),   # conv0 im2col
            pltpu.VMEM((fp, t1_alloc), jnp.float32),         # padded BN1 image
            pltpu.VMEM((k * k * fp, l1_out), jnp.float32),   # conv1 im2col
        ],
        compiler_params=pltpu.CompilerParams(
            dimension_semantics=("arbitrary",)),
    )(xp_flat, mask0, mask1, w0s, b0, g1, be1, w1s, b1, g2, be2)

    # -------- wrapper-side unpacking: flat padded grid -> NCHW --------------
    out = out[:f]
    if l1_out >= t1:
        out_t1 = out[:, :t1]
    else:
        out_t1 = jnp.pad(out, ((0, 0), (0, t1 - l1_out)))
    y = out_t1.reshape(f, n, hp1, wp1)[:, :, :h_out2, :w_out2]
    return jnp.transpose(y, (1, 0, 2, 3))                # [N, F, H_out2, W_out2]


# ----------------------------------------------------------------------------
# Pure-JAX reference (sanity check only)
# ----------------------------------------------------------------------------
def _ref_block(x_nchw, w, b, g, be, padding, dilation):
    y = lax.conv_general_dilated(
        x_nchw, w, window_strides=(1, 1),
        padding=((padding, padding), (padding, padding)),
        rhs_dilation=(dilation, dilation),
        dimension_numbers=("NCHW", "OIHW", "NCHW"))
    y = y + b[None, :, None, None]
    y = jnp.where(y >= 0, y, NEG_SLOPE * y)
    mean = jnp.mean(y, axis=(0, 2, 3), keepdims=True)
    var = jnp.mean((y - mean) ** 2, axis=(0, 2, 3), keepdims=True)
    y = (y - mean) * lax.rsqrt(var + BN_EPS)
    return y * g[None, :, None, None] + be[None, :, None, None]


def _ref_forward(x_nchw, params, padding, dilation):
    y = _ref_block(x_nchw, params["w0"], params["b0"], params["g1"],
                   params["be1"], padding, dilation)
    y = _ref_block(y, params["w1"], params["b1"], params["g2"],
                   params["be2"], padding, dilation)
    return y


# ----------------------------------------------------------------------------
if __name__ == "__main__":
    # Module config: input_shape=(2,4,16,16), num_filters=8, kernel_size=3,
    # padding=1, bias=True, dilation=1.
    N, C, H, W = 2, 4, 16, 16
    num_filters, kernel_size, padding, dilation = 8, 3, 1, 1

    key = jax.random.PRNGKey(0)
    kx, kw0, kb0, kw1, kb1, kg1, kbe1, kg2, kbe2 = jax.random.split(key, 9)

    x = jax.random.normal(kx, (N, C, H, W), dtype=jnp.float32)
    params = {
        "w0": 0.1 * jax.random.normal(
            kw0, (num_filters, C, kernel_size, kernel_size), jnp.float32),
        "b0": 0.1 * jax.random.normal(kb0, (num_filters,), jnp.float32),
        "w1": 0.1 * jax.random.normal(
            kw1, (num_filters, num_filters, kernel_size, kernel_size),
            jnp.float32),
        "b1": 0.1 * jax.random.normal(kb1, (num_filters,), jnp.float32),
        # BatchNorm affine params (PyTorch default is gamma=1, beta=0; random
        # values here give a stronger deterministic test).
        "g1": 1.0 + 0.1 * jax.random.normal(kg1, (num_filters,), jnp.float32),
        "be1": 0.1 * jax.random.normal(kbe1, (num_filters,), jnp.float32),
        "g2": 1.0 + 0.1 * jax.random.normal(kg2, (num_filters,), jnp.float32),
        "be2": 0.1 * jax.random.normal(kbe2, (num_filters,), jnp.float32),
    }

    out = conv_processing_block_bn_forward(
        x, params, kernel_size=kernel_size, padding=padding,
        dilation=dilation)
    out = jax.block_until_ready(out)

    ref = jax.block_until_ready(_ref_forward(x, params, padding, dilation))
    assert out.shape == (N, num_filters, H, W), out.shape
    assert jnp.allclose(out, ref, atol=2e-4, rtol=2e-4), (
        float(jnp.max(jnp.abs(out - ref))))

    print("KERNEL_OK")
</pallas_src>

<mosaic_0001>
module attributes {stable_mosaic.version = 11 : i64} {
  func.func @kernel(%arg0: i32, %arg1: memref<8x678xf32, #tpu.memory_space<vmem>>, %arg2: memref<1x640xf32, #tpu.memory_space<vmem>>, %arg3: memref<1x640xf32, #tpu.memory_space<vmem>>, %arg4: memref<8x72xf32, #tpu.memory_space<vmem>>, %arg5: memref<8x1xf32, #tpu.memory_space<vmem>>, %arg6: memref<8x1xf32, #tpu.memory_space<vmem>>, %arg7: memref<8x1xf32, #tpu.memory_space<vmem>>, %arg8: memref<8x72xf32, #tpu.memory_space<vmem>>, %arg9: memref<8x1xf32, #tpu.memory_space<vmem>>, %arg10: memref<8x1xf32, #tpu.memory_space<vmem>>, %arg11: memref<8x1xf32, #tpu.memory_space<vmem>>, %arg12: memref<8x640xf32, #tpu.memory_space<vmem>>, %arg13: memref<72x640xf32, #tpu.memory_space<vmem>>, %arg14: memref<8x678xf32, #tpu.memory_space<vmem>>, %arg15: memref<72x640xf32, #tpu.memory_space<vmem>>) attributes {dimension_semantics = [#tpu.dimension_semantics<arbitrary>], iteration_bounds = array<i64: 1>, scalar_prefetch = 0 : i64, scratch_operands = 3 : i64, tpu.core_type = #tpu.core_type<tc>, window_params = [{pipeline_mode = #tpu.pipeline_mode<synchronous>, transform_indices = @transform_0, window_bounds = array<i64: 8, 678>}, {pipeline_mode = #tpu.pipeline_mode<synchronous>, transform_indices = @transform_1, window_bounds = array<i64: 1, 640>}, {pipeline_mode = #tpu.pipeline_mode<synchronous>, transform_indices = @transform_2, window_bounds = array<i64: 1, 640>}, {pipeline_mode = #tpu.pipeline_mode<synchronous>, transform_indices = @transform_3, window_bounds = array<i64: 8, 72>}, {pipeline_mode = #tpu.pipeline_mode<synchronous>, transform_indices = @transform_4, window_bounds = array<i64: 8, 1>}, {pipeline_mode = #tpu.pipeline_mode<synchronous>, transform_indices = @transform_5, window_bounds = array<i64: 8, 1>}, {pipeline_mode = #tpu.pipeline_mode<synchronous>, transform_indices = @transform_6, window_bounds = array<i64: 8, 1>}, {pipeline_mode = #tpu.pipeline_mode<synchronous>, transform_indices = @transform_7, window_bounds = array<i64: 8, 72>}, {pipeline_mode = #tpu.pipeline_mode<synchronous>, transform_indices = @transform_8, window_bounds = array<i64: 8, 1>}, {pipeline_mode = #tpu.pipeline_mode<synchronous>, transform_indices = @transform_9, window_bounds = array<i64: 8, 1>}, {pipeline_mode = #tpu.pipeline_mode<synchronous>, transform_indices = @transform_10, window_bounds = array<i64: 8, 1>}, {pipeline_mode = #tpu.pipeline_mode<synchronous>, transform_indices = @transform_11, window_bounds = array<i64: 8, 640>}]} {
    %c0 = arith.constant 0 : index
    %c0_0 = arith.constant 0 : index
    %0 = vector.load %arg1[%c0, %c0_0] : memref<8x678xf32, #tpu.memory_space<vmem>>, vector<8x640xf32>
    %c0_1 = arith.constant 0 : index
    %c0_2 = arith.constant 0 : index
    %1 = vector.load %arg13[%c0_1, %c0_2] : memref<72x640xf32, #tpu.memory_space<vmem>>, vector<8x640xf32>
    tpu.vector_store %arg13[%c0_1, %c0_2], %0 {strides = array<i32>} : memref<72x640xf32, #tpu.memory_space<vmem>>, vector<8x640xf32>,
    %c0_3 = arith.constant 0 : index
    %c1 = arith.constant 1 : index
    %2 = vector.load %arg1[%c0_3, %c1] : memref<8x678xf32, #tpu.memory_space<vmem>>, vector<8x640xf32>
    %c8 = arith.constant 8 : index
    %c0_4 = arith.constant 0 : index
    %3 = vector.load %arg13[%c8, %c0_4] : memref<72x640xf32, #tpu.memory_space<vmem>>, vector<8x640xf32>
    tpu.vector_store %arg13[%c8, %c0_4], %2 {strides = array<i32>} : memref<72x640xf32, #tpu.memory_space<vmem>>, vector<8x640xf32>,
    %c0_5 = arith.constant 0 : index
    %c2 = arith.constant 2 : index
    %4 = vector.load %arg1[%c0_5, %c2] : memref<8x678xf32, #tpu.memory_space<vmem>>, vector<8x640xf32>
    %c16 = arith.constant 16 : index
    %c0_6 = arith.constant 0 : index
    %5 = vector.load %arg13[%c16, %c0_6] : memref<72x640xf32, #tpu.memory_space<vmem>>, vector<8x640xf32>
    tpu.vector_store %arg13[%c16, %c0_6], %4 {strides = array<i32>} : memref<72x640xf32, #tpu.memory_space<vmem>>, vector<8x640xf32>,
    %c0_7 = arith.constant 0 : index
    %c18 = arith.constant 18 : index
    %6 = vector.load %arg1[%c0_7, %c18] : memref<8x678xf32, #tpu.memory_space<vmem>>, vector<8x640xf32>
    %c24 = arith.constant 24 : index
    %c0_8 = arith.constant 0 : index
    %7 = vector.load %arg13[%c24, %c0_8] : memref<72x640xf32, #tpu.memory_space<vmem>>, vector<8x640xf32>
    tpu.vector_store %arg13[%c24, %c0_8], %6 {strides = array<i32>} : memref<72x640xf32, #tpu.memory_space<vmem>>, vector<8x640xf32>,
    %c0_9 = arith.constant 0 : index
    %c19 = arith.constant 19 : index
    %8 = vector.load %arg1[%c0_9, %c19] : memref<8x678xf32, #tpu.memory_space<vmem>>, vector<8x640xf32>
    %c32 = arith.constant 32 : index
    %c0_10 = arith.constant 0 : index
    %9 = vector.load %arg13[%c32, %c0_10] : memref<72x640xf32, #tpu.memory_space<vmem>>, vector<8x640xf32>
    tpu.vector_store %arg13[%c32, %c0_10], %8 {strides = array<i32>} : memref<72x640xf32, #tpu.memory_space<vmem>>, vector<8x640xf32>,
    %c0_11 = arith.constant 0 : index
    %c20 = arith.constant 20 : index
    %10 = vector.load %arg1[%c0_11, %c20] : memref<8x678xf32, #tpu.memory_space<vmem>>, vector<8x640xf32>
    %c40 = arith.constant 40 : index
    %c0_12 = arith.constant 0 : index
    %11 = vector.load %arg13[%c40, %c0_12] : memref<72x640xf32, #tpu.memory_space<vmem>>, vector<8x640xf32>
    tpu.vector_store %arg13[%c40, %c0_12], %10 {strides = array<i32>} : memref<72x640xf32, #tpu.memory_space<vmem>>, vector<8x640xf32>,
    %c0_13 = arith.constant 0 : index
    %c36 = arith.constant 36 : index
    %12 = vector.load %arg1[%c0_13, %c36] : memref<8x678xf32, #tpu.memory_space<vmem>>, vector<8x640xf32>
    %c48 = arith.constant 48 : index
    %c0_14 = arith.constant 0 : index
    %13 = vector.load %arg13[%c48, %c0_14] : memref<72x640xf32, #tpu.memory_space<vmem>>, vector<8x640xf32>
    tpu.vector_store %arg13[%c48, %c0_14], %12 {strides = array<i32>} : memref<72x640xf32, #tpu.memory_space<vmem>>, vector<8x640xf32>,
    %c0_15 = arith.constant 0 : index
    %c37 = arith.constant 37 : index
    %14 = vector.load %arg1[%c0_15, %c37] : memref<8x678xf32, #tpu.memory_space<vmem>>, vector<8x640xf32>
    %c56 = arith.constant 56 : index
    %c0_16 = arith.constant 0 : index
    %15 = vector.load %arg13[%c56, %c0_16] : memref<72x640xf32, #tpu.memory_space<vmem>>, vector<8x640xf32>
    tpu.vector_store %arg13[%c56, %c0_16], %14 {strides = array<i32>} : memref<72x640xf32, #tpu.memory_space<vmem>>, vector<8x640xf32>,
    %c0_17 = arith.constant 0 : index
    %c38 = arith.constant 38 : index
    %16 = vector.load %arg1[%c0_17, %c38] : memref<8x678xf32, #tpu.memory_space<vmem>>, vector<8x640xf32>
    %c64 = arith.constant 64 : index
    %c0_18 = arith.constant 0 : index
    %17 = vector.load %arg13[%c64, %c0_18] : memref<72x640xf32, #tpu.memory_space<vmem>>, vector<8x640xf32>
    tpu.vector_store %arg13[%c64, %c0_18], %16 {strides = array<i32>} : memref<72x640xf32, #tpu.memory_space<vmem>>, vector<8x640xf32>,
    %c0_19 = arith.constant 0 : index
    %c0_20 = arith.constant 0 : index
    %18 = vector.load %arg4[%c0_19, %c0_20] : memref<8x72xf32, #tpu.memory_space<vmem>>, vector<8x72xf32>
    %c0_21 = arith.constant 0 : index
    %c0_22 = arith.constant 0 : index
    %19 = vector.load %arg13[%c0_21, %c0_22] : memref<72x640xf32, #tpu.memory_space<vmem>>, vector<72x640xf32>
    %cst = arith.constant dense<0.000000e+00> : vector<8x640xf32>
    %20 = tpu.matmul %18, %19, %cst {dimension_numbers = #tpu.dot_dimension_numbers<[1], [0], [0], [1], [0, 0, 1, 1], [], []>} : vector<8x72xf32>, vector<72x640xf32>, vector<8x640xf32> -> vector<8x640xf32>
    %c0_23 = arith.constant 0 : index
    %c0_24 = arith.constant 0 : index
    %21 = vector.load %arg5[%c0_23, %c0_24] : memref<8x1xf32, #tpu.memory_space<vmem>>, vector<8x1xf32>
    %22 = vector.broadcast %21 : vector<8x1xf32> to vector<8x640xf32>
    %23 = arith.addf %20, %22 : vector<8x640xf32>
    %cst_25 = arith.constant 0.000000e+00 : f32
    %24 = vector.broadcast %cst_25 : f32 to vector<8x640xf32>
    %25 = arith.cmpf oge, %23, %24 : vector<8x640xf32>
    %cst_26 = arith.constant 0.00999999977 : f32
    %26 = vector.broadcast %cst_26 : f32 to vector<8x640xf32>
    %27 = arith.mulf %26, %23 : vector<8x640xf32>
    %28 = arith.select %25, %23, %27 : vector<8x640xi1>, vector<8x640xf32>
    %c0_27 = arith.constant 0 : index
    %c0_28 = arith.constant 0 : index
    %29 = vector.load %arg2[%c0_27, %c0_28] : memref<1x640xf32, #tpu.memory_space<vmem>>, vector<1x640xf32>
    %30 = vector.broadcast %29 : vector<1x640xf32> to vector<8x640xf32>
    %31 = arith.mulf %28, %30 : vector<8x640xf32>
    %cst_29 = arith.constant dense<0.000000e+00> : vector<8xf32>
    %32 = vector.multi_reduction <add>, %31, %cst_29 [1] : vector<8x640xf32> to vector<8xf32>
    %33 = vector.shape_cast %32 : vector<8xf32> to vector<8x1xf32>
    %cst_30 = arith.constant 0.001953125 : f32
    %34 = vector.broadcast %cst_30 : f32 to vector<8x1xf32>
    %35 = arith.mulf %33, %34 : vector<8x1xf32>
    %36 = vector.broadcast %35 : vector<8x1xf32> to vector<8x640xf32>
    %37 = arith.subf %28, %36 : vector<8x640xf32>
    %38 = vector.broadcast %29 : vector<1x640xf32> to vector<8x640xf32>
    %39 = arith.mulf %37, %38 : vector<8x640xf32>
    %40 = arith.mulf %39, %39 : vector<8x640xf32>
    %cst_31 = arith.constant dense<0.000000e+00> : vector<8xf32>
    %41 = vector.multi_reduction <add>, %40, %cst_31 [1] : vector<8x640xf32> to vector<8xf32>
    %42 = vector.shape_cast %41 : vector<8xf32> to vector<8x1xf32>
    %cst_32 = arith.constant 0.001953125 : f32
    %43 = vector.broadcast %cst_32 : f32 to vector<8x1xf32>
    %44 = arith.mulf %42, %43 : vector<8x1xf32>
    %cst_33 = arith.constant 9.99999974E-6 : f32
    %45 = vector.broadcast %cst_33 : f32 to vector<8x1xf32>
    %46 = arith.addf %44, %45 : vector<8x1xf32>
    %47 = math.rsqrt %46 : vector<8x1xf32>
    %c0_34 = arith.constant 0 : index
    %c0_35 = arith.constant 0 : index
    %48 = vector.load %arg6[%c0_34, %c0_35] : memref<8x1xf32, #tpu.memory_space<vmem>>, vector<8x1xf32>
    %49 = arith.mulf %47, %48 : vector<8x1xf32>
    %c0_36 = arith.constant 0 : index
    %c0_37 = arith.constant 0 : index
    %50 = vector.load %arg7[%c0_36, %c0_37] : memref<8x1xf32, #tpu.memory_space<vmem>>, vector<8x1xf32>
    %51 = arith.mulf %35, %49 : vector<8x1xf32>
    %52 = arith.subf %50, %51 : vector<8x1xf32>
    %53 = vector.broadcast %49 : vector<8x1xf32> to vector<8x640xf32>
    %54 = arith.mulf %28, %53 : vector<8x640xf32>
    %55 = vector.broadcast %52 : vector<8x1xf32> to vector<8x640xf32>
    %56 = arith.addf %54, %55 : vector<8x640xf32>
    %cst_38 = arith.constant 0.000000e+00 : f32
    %57 = vector.broadcast %cst_38 : f32 to vector<8x678xf32>
    %c0_39 = arith.constant 0 : index
    %c0_40 = arith.constant 0 : index
    %58 = vector.load %arg14[%c0_39, %c0_40] : memref<8x678xf32, #tpu.memory_space<vmem>>, vector<8x678xf32>
    tpu.vector_store %arg14[%c0_39, %c0_40], %57 {strides = array<i32>} : memref<8x678xf32, #tpu.memory_space<vmem>>, vector<8x678xf32>,
    %59 = vector.broadcast %29 : vector<1x640xf32> to vector<8x640xf32>
    %60 = arith.mulf %56, %59 : vector<8x640xf32>
    %c0_41 = arith.constant 0 : index
    %c19_42 = arith.constant 19 : index
    %61 = vector.load %arg14[%c0_41, %c19_42] : memref<8x678xf32, #tpu.memory_space<vmem>>, vector<8x640xf32>
    tpu.vector_store %arg14[%c0_41, %c19_42], %60 {strides = array<i32>} : memref<8x678xf32, #tpu.memory_space<vmem>>, vector<8x640xf32>,
    %c0_43 = arith.constant 0 : index
    %c0_44 = arith.constant 0 : index
    %62 = vector.load %arg14[%c0_43, %c0_44] : memref<8x678xf32, #tpu.memory_space<vmem>>, vector<8x640xf32>
    %c0_45 = arith.constant 0 : index
    %c0_46 = arith.constant 0 : index
    %63 = vector.load %arg15[%c0_45, %c0_46] : memref<72x640xf32, #tpu.memory_space<vmem>>, vector<8x640xf32>
    tpu.vector_store %arg15[%c0_45, %c0_46], %62 {strides = array<i32>} : memref<72x640xf32, #tpu.memory_space<vmem>>, vector<8x640xf32>,
    %c0_47 = arith.constant 0 : index
    %c1_48 = arith.constant 1 : index
    %64 = vector.load %arg14[%c0_47, %c1_48] : memref<8x678xf32, #tpu.memory_space<vmem>>, vector<8x640xf32>
    %c8_49 = arith.constant 8 : index
    %c0_50 = arith.constant 0 : index
    %65 = vector.load %arg15[%c8_49, %c0_50] : memref<72x640xf32, #tpu.memory_space<vmem>>, vector<8x640xf32>
    tpu.vector_store %arg15[%c8_49, %c0_50], %64 {strides = array<i32>} : memref<72x640xf32, #tpu.memory_space<vmem>>, vector<8x640xf32>,
    %c0_51 = arith.constant 0 : index
    %c2_52 = arith.constant 2 : index
    %66 = vector.load %arg14[%c0_51, %c2_52] : memref<8x678xf32, #tpu.memory_space<vmem>>, vector<8x640xf32>
    %c16_53 = arith.constant 16 : index
    %c0_54 = arith.constant 0 : index
    %67 = vector.load %arg15[%c16_53, %c0_54] : memref<72x640xf32, #tpu.memory_space<vmem>>, vector<8x640xf32>
    tpu.vector_store %arg15[%c16_53, %c0_54], %66 {strides = array<i32>} : memref<72x640xf32, #tpu.memory_space<vmem>>, vector<8x640xf32>,
    %c0_55 = arith.constant 0 : index
    %c18_56 = arith.constant 18 : index
    %68 = vector.load %arg14[%c0_55, %c18_56] : memref<8x678xf32, #tpu.memory_space<vmem>>, vector<8x640xf32>
    %c24_57 = arith.constant 24 : index
    %c0_58 = arith.constant 0 : index
    %69 = vector.load %arg15[%c24_57, %c0_58] : memref<72x640xf32, #tpu.memory_space<vmem>>, vector<8x640xf32>
    tpu.vector_store %arg15[%c24_57, %c0_58], %68 {strides = array<i32>} : memref<72x640xf32, #tpu.memory_space<vmem>>, vector<8x640xf32>,
    %c0_59 = arith.constant 0 : index
    %c19_60 = arith.constant 19 : index
    %70 = vector.load %arg14[%c0_59, %c19_60] : memref<8x678xf32, #tpu.memory_space<vmem>>, vector<8x640xf32>
    %c32_61 = arith.constant 32 : index
    %c0_62 = arith.constant 0 : index
    %71 = vector.load %arg15[%c32_61, %c0_62] : memref<72x640xf32, #tpu.memory_space<vmem>>, vector<8x640xf32>
    tpu.vector_store %arg15[%c32_61, %c0_62], %70 {strides = array<i32>} : memref<72x640xf32, #tpu.memory_space<vmem>>, vector<8x640xf32>,
    %c0_63 = arith.constant 0 : index
    %c20_64 = arith.constant 20 : index
    %72 = vector.load %arg14[%c0_63, %c20_64] : memref<8x678xf32, #tpu.memory_space<vmem>>, vector<8x640xf32>
    %c40_65 = arith.constant 40 : index
    %c0_66 = arith.constant 0 : index
    %73 = vector.load %arg15[%c40_65, %c0_66] : memref<72x640xf32, #tpu.memory_space<vmem>>, vector<8x640xf32>
    tpu.vector_store %arg15[%c40_65, %c0_66], %72 {strides = array<i32>} : memref<72x640xf32, #tpu.memory_space<vmem>>, vector<8x640xf32>,
    %c0_67 = arith.constant 0 : index
    %c36_68 = arith.constant 36 : index
    %74 = vector.load %arg14[%c0_67, %c36_68] : memref<8x678xf32, #tpu.memory_space<vmem>>, vector<8x640xf32>
    %c48_69 = arith.constant 48 : index
    %c0_70 = arith.constant 0 : index
    %75 = vector.load %arg15[%c48_69, %c0_70] : memref<72x640xf32, #tpu.memory_space<vmem>>, vector<8x640xf32>
    tpu.vector_store %arg15[%c48_69, %c0_70], %74 {strides = array<i32>} : memref<72x640xf32, #tpu.memory_space<vmem>>, vector<8x640xf32>,
    %c0_71 = arith.constant 0 : index
    %c37_72 = arith.constant 37 : index
    %76 = vector.load %arg14[%c0_71, %c37_72] : memref<8x678xf32, #tpu.memory_space<vmem>>, vector<8x640xf32>
    %c56_73 = arith.constant 56 : index
    %c0_74 = arith.constant 0 : index
    %77 = vector.load %arg15[%c56_73, %c0_74] : memref<72x640xf32, #tpu.memory_space<vmem>>, vector<8x640xf32>
    tpu.vector_store %arg15[%c56_73, %c0_74], %76 {strides = array<i32>} : memref<72x640xf32, #tpu.memory_space<vmem>>, vector<8x640xf32>,
    %c0_75 = arith.constant 0 : index
    %c38_76 = arith.constant 38 : index
    %78 = vector.load %arg14[%c0_75, %c38_76] : memref<8x678xf32, #tpu.memory_space<vmem>>, vector<8x640xf32>
    %c64_77 = arith.constant 64 : index
    %c0_78 = arith.constant 0 : index
    %79 = vector.load %arg15[%c64_77, %c0_78] : memref<72x640xf32, #tpu.memory_space<vmem>>, vector<8x640xf32>
    tpu.vector_store %arg15[%c64_77, %c0_78], %78 {strides = array<i32>} : memref<72x640xf32, #tpu.memory_space<vmem>>, vector<8x640xf32>,
    %c0_79 = arith.constant 0 : index
    %c0_80 = arith.constant 0 : index
    %80 = vector.load %arg8[%c0_79, %c0_80] : memref<8x72xf32, #tpu.memory_space<vmem>>, vector<8x72xf32>
    %c0_81 = arith.constant 0 : index
    %c0_82 = arith.constant 0 : index
    %81 = vector.load %arg15[%c0_81, %c0_82] : memref<72x640xf32, #tpu.memory_space<vmem>>, vector<72x640xf32>
    %cst_83 = arith.constant dense<0.000000e+00> : vector<8x640xf32>
    %82 = tpu.matmul %80, %81, %cst_83 {dimension_numbers = #tpu.dot_dimension_numbers<[1], [0], [0], [1], [0, 0, 1, 1], [], []>} : vector<8x72xf32>, vector<72x640xf32>, vector<8x640xf32> -> vector<8x640xf32>
    %c0_84 = arith.constant 0 : index
    %c0_85 = arith.constant 0 : index
    %83 = vector.load %arg9[%c0_84, %c0_85] : memref<8x1xf32, #tpu.memory_space<vmem>>, vector<8x1xf32>
    %84 = vector.broadcast %83 : vector<8x1xf32> to vector<8x640xf32>
    %85 = arith.addf %82, %84 : vector<8x640xf32>
    %cst_86 = arith.constant 0.000000e+00 : f32
    %86 = vector.broadcast %cst_86 : f32 to vector<8x640xf32>
    %87 = arith.cmpf oge, %85, %86 : vector<8x640xf32>
    %cst_87 = arith.constant 0.00999999977 : f32
    %88 = vector.broadcast %cst_87 : f32 to vector<8x640xf32>
    %89 = arith.mulf %88, %85 : vector<8x640xf32>
    %90 = arith.select %87, %85, %89 : vector<8x640xi1>, vector<8x640xf32>
    %c0_88 = arith.constant 0 : index
    %c0_89 = arith.constant 0 : index
    %91 = vector.load %arg3[%c0_88, %c0_89] : memref<1x640xf32, #tpu.memory_space<vmem>>, vector<1x640xf32>
    %92 = vector.broadcast %91 : vector<1x640xf32> to vector<8x640xf32>
    %93 = arith.mulf %90, %92 : vector<8x640xf32>
    %cst_90 = arith.constant dense<0.000000e+00> : vector<8xf32>
    %94 = vector.multi_reduction <add>, %93, %cst_90 [1] : vector<8x640xf32> to vector<8xf32>
    %95 = vector.shape_cast %94 : vector<8xf32> to vector<8x1xf32>
    %cst_91 = arith.constant 0.001953125 : f32
    %96 = vector.broadcast %cst_91 : f32 to vector<8x1xf32>
    %97 = arith.mulf %95, %96 : vector<8x1xf32>
    %98 = vector.broadcast %97 : vector<8x1xf32> to vector<8x640xf32>
    %99 = arith.subf %90, %98 : vector<8x640xf32>
    %100 = vector.broadcast %91 : vector<1x640xf32> to vector<8x640xf32>
    %101 = arith.mulf %99, %100 : vector<8x640xf32>
    %102 = arith.mulf %101, %101 : vector<8x640xf32>
    %cst_92 = arith.constant dense<0.000000e+00> : vector<8xf32>
    %103 = vector.multi_reduction <add>, %102, %cst_92 [1] : vector<8x640xf32> to vector<8xf32>
    %104 = vector.shape_cast %103 : vector<8xf32> to vector<8x1xf32>
    %cst_93 = arith.constant 0.001953125 : f32
    %105 = vector.broadcast %cst_93 : f32 to vector<8x1xf32>
    %106 = arith.mulf %104, %105 : vector<8x1xf32>
    %cst_94 = arith.constant 9.99999974E-6 : f32
    %107 = vector.broadcast %cst_94 : f32 to vector<8x1xf32>
    %108 = arith.addf %106, %107 : vector<8x1xf32>
    %109 = math.rsqrt %108 : vector<8x1xf32>
    %c0_95 = arith.constant 0 : index
    %c0_96 = arith.constant 0 : index
    %110 = vector.load %arg10[%c0_95, %c0_96] : memref<8x1xf32, #tpu.memory_space<vmem>>, vector<8x1xf32>
    %111 = arith.mulf %109, %110 : vector<8x1xf32>
    %c0_97 = arith.constant 0 : index
    %c0_98 = arith.constant 0 : index
    %112 = vector.load %arg11[%c0_97, %c0_98] : memref<8x1xf32, #tpu.memory_space<vmem>>, vector<8x1xf32>
    %113 = arith.mulf %97, %111 : vector<8x1xf32>
    %114 = arith.subf %112, %113 : vector<8x1xf32>
    %115 = vector.broadcast %111 : vector<8x1xf32> to vector<8x640xf32>
    %116 = arith.mulf %90, %115 : vector<8x640xf32>
    %117 = vector.broadcast %114 : vector<8x1xf32> to vector<8x640xf32>
    %118 = arith.addf %116, %117 : vector<8x640xf32>
    %c0_99 = arith.constant 0 : index
    %c0_100 = arith.constant 0 : index
    %119 = vector.load %arg12[%c0_99, %c0_100] : memref<8x640xf32, #tpu.memory_space<vmem>>, vector<8x640xf32>
    tpu.vector_store %arg12[%c0_99, %c0_100], %118 {strides = array<i32>} : memref<8x640xf32, #tpu.memory_space<vmem>>, vector<8x640xf32>,
    return
  }
  func.func @transform_0(%arg0: i32) -> (i32, i32) {
    %c0_i32 = arith.constant 0 : i32
    %c0_i32_0 = arith.constant 0 : i32
    %c0_i32_1 = arith.constant 0 : i32
    return %c0_i32, %c0_i32_0 : i32, i32
  }
  func.func @transform_1(%arg0: i32) -> (i32, i32) {
    %c0_i32 = arith.constant 0 : i32
    %c0_i32_0 = arith.constant 0 : i32
    %c0_i32_1 = arith.constant 0 : i32
    return %c0_i32, %c0_i32_0 : i32, i32
  }
  func.func @transform_2(%arg0: i32) -> (i32, i32) {
    %c0_i32 = arith.constant 0 : i32
    %c0_i32_0 = arith.constant 0 : i32
    %c0_i32_1 = arith.constant 0 : i32
    return %c0_i32, %c0_i32_0 : i32, i32
  }
  func.func @transform_3(%arg0: i32) -> (i32, i32) {
    %c0_i32 = arith.constant 0 : i32
    %c0_i32_0 = arith.constant 0 : i32
    %c0_i32_1 = arith.constant 0 : i32
    return %c0_i32, %c0_i32_0 : i32, i32
  }
  func.func @transform_4(%arg0: i32) -> (i32, i32) {
    %c0_i32 = arith.constant 0 : i32
    %c0_i32_0 = arith.constant 0 : i32
    %c0_i32_1 = arith.constant 0 : i32
    return %c0_i32, %c0_i32_0 : i32, i32
  }
  func.func @transform_5(%arg0: i32) -> (i32, i32) {
    %c0_i32 = arith.constant 0 : i32
    %c0_i32_0 = arith.constant 0 : i32
    %c0_i32_1 = arith.constant 0 : i32
    return %c0_i32, %c0_i32_0 : i32, i32
  }
  func.func @transform_6(%arg0: i32) -> (i32, i32) {
    %c0_i32 = arith.constant 0 : i32
    %c0_i32_0 = arith.constant 0 : i32
    %c0_i32_1 = arith.constant 0 : i32
    return %c0_i32, %c0_i32_0 : i32, i32
  }
  func.func @transform_7(%arg0: i32) -> (i32, i32) {
    %c0_i32 = arith.constant 0 : i32
    %c0_i32_0 = arith.constant 0 : i32
    %c0_i32_1 = arith.constant 0 : i32
    return %c0_i32, %c0_i32_0 : i32, i32
  }
  func.func @transform_8(%arg0: i32) -> (i32, i32) {
    %c0_i32 = arith.constant 0 : i32
    %c0_i32_0 = arith.constant 0 : i32
    %c0_i32_1 = arith.constant 0 : i32
    return %c0_i32, %c0_i32_0 : i32, i32
  }
  func.func @transform_9(%arg0: i32) -> (i32, i32) {
    %c0_i32 = arith.constant 0 : i32
    %c0_i32_0 = arith.constant 0 : i32
    %c0_i32_1 = arith.constant 0 : i32
    return %c0_i32, %c0_i32_0 : i32, i32
  }
  func.func @transform_10(%arg0: i32) -> (i32, i32) {
    %c0_i32 = arith.constant 0 : i32
    %c0_i32_0 = arith.constant 0 : i32
    %c0_i32_1 = arith.constant 0 : i32
    return %c0_i32, %c0_i32_0 : i32, i32
  }
  func.func @transform_11(%arg0: i32) -> (i32, i32) {
    %c0_i32 = arith.constant 0 : i32
    %c0_i32_0 = arith.constant 0 : i32
    %c0_i32_1 = arith.constant 0 : i32
    return %c0_i32, %c0_i32_0 : i32, i32
  }
}

</mosaic_0001>

<bundles_post_ra>
// kernel: conv_processing_block_bn_forward.1
= control target key start
LH: loop header
LB: loop body
LE: loop exit
PB: predicated region body
PF: predicated region fallthrough
CT: control target
= control target key end

     0   :  { %s1491_s25 = smov 90   ;;  %s1492_s26 = smov 92   ;;  %vm352_vm0 = vcmask 736256   ;;  %vm312_vm1 = vcmask 744448   ;;  %vm272_vm2 = vcmask 752640   ;;  %vm232_vm3 = vcmask 883712   ;;  %s1972_s0 = inlined_call_operand.vmem [shape: f32[8,678], index: 0, kind: input, shape index: {}]   ;;  %s1973_s4 = inlined_call_operand.vmem [shape: f32[8,1], index: 4, kind: input, shape index: {}]   ;;  %s1974_s3 = inlined_call_operand.vmem [shape: f32[8,72], index: 3, kind: input, shape index: {}]   ;;  %s1975_s1 = inlined_call_operand.vmem [shape: f32[1,640], index: 1, kind: input, shape index: {}, may-alias: {1,2}]   ;;  %s1976_s5 = inlined_call_operand.vmem [shape: f32[8,1], index: 5, kind: input, shape index: {}]   ;;  %s1977_s6 = inlined_call_operand.vmem [shape: f32[8,1], index: 6, kind: input, shape index: {}]   ;;  %s1978_s8 = inlined_call_operand.vmem [shape: f32[8,1], index: 8, kind: input, shape index: {}]   ;;  %s1979_s7 = inlined_call_operand.vmem [shape: f32[8,72], index: 7, kind: input, shape index: {}]   ;;  %s1980_s2 = inlined_call_operand.vmem [shape: f32[1,640], index: 2, kind: input, shape index: {}, may-alias: {1,2}]   ;;  %s1981_s9 = inlined_call_operand.vmem [shape: f32[8,1], index: 9, kind: input, shape index: {}]   ;;  %s1982_s10 = inlined_call_operand.vmem [shape: f32[8,1], index: 10, kind: input, shape index: {}]   ;;  %s1983_s11 = inlined_call_operand.vmem [shape: f32[8,640], index: 11, kind: output, shape index: {}]  }
   0x1   :  { %v1565_v0 = vld [vmem:[%s1972_s0 + $0x10] sm:$0xff]  ;;  %v1570_v1 = vld [vmem:[%s1972_s0 + $0x18] sm:$0xff]  ;;  %v1575_v2 = vld [vmem:[%s1972_s0] sm:$0xff]  ;;  %s1493_s12 = smov 91   ;;  %s1494_s13 = smov 108   ;;  %vm192_vm4 = vcmask 891904  }
   0x2   :  { %v1270_v3 = vpack.i.bf16 %v1570_v1, %v1565_v0  ;;  %v1582_v4 = vld [vmem:[%s1972_s0 + $0x8] sm:$0xff]  ;;  %v1592_v6 = vld [vmem:[%s1972_s0 + $0x20] sm:$0xff]  ;;  %s1496_s14 = smov 110   ;;  %s1497_s15 = smov 126   ;;  %vm152_vm5 = vcmask 900096   ;;  %vm112_vm6 = vcmask 1031168  }
   0x3   :  { %v1280_v5 = vpack.i.bf16 %v1582_v4, %v1575_v2  ;;  %v333_v7 = vld [vmem:[%s1972_s0 + $0x28] sm:$0xff]  ;;  %s1495_s0 = smov 109   ;;  %s1498_s16 = smov 127   ;;  %vm72_vm7 = vcmask 1039360   ;;  %vm420_vm8 = vcmask 588800  }
   0x4   :  { %1271 = vrot.lane.b32.xlu0 %v1270_v3, %s1491_s25  ;;  %1291 = vrot.lane.b32.xlu2 %v1270_v3, %s1492_s26  ;;  %v1285_v8 = vpack.i.bf16 %v333_v7, %v1592_v6 }
   0x5   :  { %1281 = vrot.lane.b32.xlu1 %v1280_v5, %s1491_s25 }
   0xc   :  { %1276 = vrot.lane.b32.xlu0 %v1270_v3, %s1493_s12  ;;  %1296 = vrot.lane.b32.xlu2 %v1280_v5, %s1493_s12 }
   0xd   :  { %1286 = vrot.lane.b32.xlu1 %v1285_v8, %s1491_s25 }
  0x14   :  { %1301 = vrot.lane.b32.xlu0 %v1285_v8, %s1493_s12  ;;  %1311 = vrot.lane.b32.xlu2 %v1280_v5, %s1492_s26 }
  0x15   :  { %1306 = vrot.lane.b32.xlu1 %v1270_v3, %s1494_s13 }
  0x1c   :  { %1316 = vrot.lane.b32.xlu0 %v1285_v8, %s1492_s26  ;;  %1326 = vrot.lane.b32.xlu2 %v1280_v5, %s1494_s13 }
  0x1d   :  { %1321 = vrot.lane.b32.xlu1 %v1270_v3, %s1495_s0 }
  0x24   :  { %228 = vrot.lane.b32.xlu0 %v1592_v6, %s1494_s13  ;;  %1336 = vrot.lane.b32.xlu2 %v1280_v5, %s1495_s0 }
  0x25   :  { %1331 = vrot.lane.b32.xlu1 %v1270_v3, %s1496_s14 }
  0x2c   :  { %188 = vrot.lane.b32.xlu0 %v1592_v6, %s1495_s0  ;;  %1346 = vrot.lane.b32.xlu2 %v1280_v5, %s1496_s14 }
  0x2d   :  { %1341 = vrot.lane.b32.xlu1 %v1270_v3, %s1497_s15 }
  0x34   :  { %148 = vrot.lane.b32.xlu0 %v1592_v6, %s1496_s14  ;;  %1356 = vrot.lane.b32.xlu2 %v1280_v5, %s1497_s15 }
  0x35   :  { %1351 = vrot.lane.b32.xlu1 %v1270_v3, %s1498_s16 }
  0x3c   :  { %108 = vrot.lane.b32.xlu0 %v1592_v6, %s1497_s15  ;;  %68 = vrot.lane.b32.xlu2 %v1592_v6, %s1498_s16 }
  0x3d   :  { %1361 = vrot.lane.b32.xlu1 %v1280_v5, %s1498_s16 }
  0x44   :  { %230 = vrot.lane.b32.xlu0 %v333_v7, %s1494_s13  ;;  %150 = vrot.lane.b32.xlu2 %v333_v7, %s1496_s14 }
  0x45   :  { %190 = vrot.lane.b32.xlu1 %v333_v7, %s1495_s0 }
  0x4c   :  { %110 = vrot.lane.b32.xlu0 %v333_v7, %s1497_s15 }
  0x4d   :  { %70 = vrot.lane.b32.xlu1 %v333_v7, %s1498_s16 }
  0x5e   :  { %v1629_v9 = vpop.permute.xlu2 %1291 }
  0x5f   :  { %v1294_v30 = vunpack.i.h.bf16 %v1629_v9  ;;  %v1293_v31 = vunpack.i.l.bf16 %v1629_v9 }
  0x61   :  { %v275_v46 = vsel %vm272_vm2, %v1293_v31, %v1294_v30 }
  0x66   :  { %v1297_v10 = vpop.permute.xlu2 %1296 }
  0x67   :  { %v1298_v12 = vunpack.i.l.bf16 %v1297_v10  ;;  %v1299_v15 = vunpack.i.h.bf16 %v1297_v10 }
  0x69   :  { %v313_v23 = vsel %vm312_vm1, %v1298_v12, %v1299_v15 }
  0x6e   :  { %v1312_v11 = vpop.permute.xlu2 %1311 }
  0x6f   :  { %v1313_v21 = vunpack.i.l.bf16 %v1312_v11  ;;  %v1314_v24 = vunpack.i.h.bf16 %v1312_v11 }
  0x71   :  { %v273_v29 = vsel %vm272_vm2, %v1313_v21, %v1314_v24  ;;  %v274_v45 = vsel %vm272_vm2, %v1314_v24, %v1293_v31 }
  0x76   :  { %v1272_v13 = vpop.permute.xlu0 %1271  ;;  %v1327_v14 = vpop.permute.xlu2 %1326 }
  0x77   :  { %v1274_v16 = vunpack.i.h.bf16 %v1272_v13  ;;  %v1273_v17 = vunpack.i.l.bf16 %v1272_v13  ;;  %v1282_v18 = vpop.permute.xlu1 %1281  ;;  %v1328_v27 = vunpack.i.l.bf16 %v1327_v14  ;;  %v1329_v28 = vunpack.i.h.bf16 %v1327_v14 }
  0x78   :  { %v1284_v19 = vunpack.i.h.bf16 %v1282_v18  ;;  %v1283_v20 = vunpack.i.l.bf16 %v1282_v18 }
  0x79   :  { %v355_v22 = vsel %vm352_vm0, %v1273_v17, %v1274_v16  ;;  %v233_v34 = vsel %vm232_vm3, %v1328_v27, %v1329_v28 }
  0x7a   :  { %v353_v25 = vsel %vm352_vm0, %v1283_v20, %v1284_v19  ;;  %v354_v26 = vsel %vm352_vm0, %v1284_v19, %v1273_v17  ;;  %471 = vmatpush.msra.mxu2 %v355_v22 }
  0x7b   :  { %431 = vmatpush.msra.mxu0 %v353_v25  ;;  %451 = vmatpush.msra.mxu1 %v354_v26 }
  0x7d   :  { %432 = vmatpush.msra.mxu0 %v313_v23 }
  0x7e   :  { %v1277_v32 = vpop.permute.xlu0 %1276  ;;  %v1337_v33 = vpop.permute.xlu2 %1336 }
  0x7f   :  { %v1639_v35 = vpop.permute.xlu1 %1286  ;;  %v1279_v36 = vunpack.i.h.bf16 %v1277_v32  ;;  %v1278_v37 = vunpack.i.l.bf16 %v1277_v32  ;;  %v1339_v38 = vunpack.i.h.bf16 %v1337_v33  ;;  %v1338_v39 = vunpack.i.l.bf16 %v1337_v33  ;;  %433 = vmatpush.msra.mxu0 %v273_v29  ;;  %v414_v29 = vld [vmem:[%s1973_s4] sm:$0xff] }
  0x80   :  { %v1288_v40 = vunpack.i.l.bf16 %v1639_v35  ;;  %v1499_v32 = vmov 0  }
  0x81   :  { %v314_v41 = vsel %vm312_vm1, %v1299_v15, %v1278_v37  ;;  %v315_v42 = vsel %vm312_vm1, %v1278_v37, %v1279_v36  ;;  %434 = vmatpush.msra.mxu0 %v233_v34  ;;  %v193_v43 = vsel %vm192_vm4, %v1338_v39, %v1339_v38  ;;  %1365 = vset.pattern.permute.xlu2 %v1499_v32  ;;  %v368_v34 = vld [vmem:[%s1974_s3] sm:$0xff] }
  0x82   :  { %452 = vmatpush.msra.mxu1 %v314_v41  ;;  %472 = vmatpush.msra.mxu2 %v315_v42  ;;  %v356_v44 = vsel %vm352_vm0, %v1274_v16, %v1288_v40 }
  0x83   :  { %491 = vmatpush.msra.mxu3 %v356_v44  ;;  %435 = vmatpush.msra.mxu0 %v193_v43  ;;  %v1289_v43 = vunpack.i.h.bf16 %v1639_v35 }
  0x84   :  { %453 = vmatpush.msra.mxu1 %v274_v45  ;;  %473 = vmatpush.msra.mxu2 %v275_v46 }
  0x85   :  { %417 = vperm.xlu2 %1365, %v414_v29   ;;  %1486 = vset.pattern.permute.xlu0 %v1499_v32 }
  0x86   :  { %v1650_v47 = vpop.permute.xlu0 %1301  ;;  %v1347_v48 = vpop.permute.xlu2 %1346 }
  0x87   :  { %v1303_v49 = vunpack.i.l.bf16 %v1650_v47  ;;  %v1307_v50 = vpop.permute.xlu1 %1306  ;;  %v1349_v51 = vunpack.i.h.bf16 %v1347_v48  ;;  %v1348_v52 = vunpack.i.l.bf16 %v1347_v48 }
  0x88   :  { %v1309_v53 = vunpack.i.h.bf16 %v1307_v50  ;;  %v1308_v54 = vunpack.i.l.bf16 %v1307_v50  ;;  %v357_v50 = vsel %vm352_vm0, %v1288_v40, %v1289_v43 }
  0x89   :  { %v316_v55 = vsel %vm312_vm1, %v1279_v36, %v1303_v49  ;;  %v153_v56 = vsel %vm152_vm5, %v1348_v52, %v1349_v51 }
  0x8a   :  { %v234_v57 = vsel %vm232_vm3, %v1329_v28, %v1308_v54  ;;  %v235_v58 = vsel %vm232_vm3, %v1308_v54, %v1309_v53  ;;  %492 = vmatpush.msra.mxu3 %v316_v55  ;;  %436 = vmatpush.msra.mxu0 %v153_v56 }
  0x8b   :  { %454 = vmatpush.msra.mxu1 %v234_v57  ;;  %474 = vmatpush.msra.mxu2 %v235_v58 }
  0x8e   :  { %v1659_v59 = vpop.permute.xlu0 %1316  ;;  %v1357_v60 = vpop.permute.xlu2 %1356 }
  0x8f   :  { %v1318_v61 = vunpack.i.l.bf16 %v1659_v59  ;;  %v1322_v62 = vpop.permute.xlu1 %1321  ;;  %v1359_v63 = vunpack.i.h.bf16 %v1357_v60  ;;  %v1358_v3 = vunpack.i.l.bf16 %v1357_v60  ;;  %v1319_v48 = vunpack.i.h.bf16 %v1659_v59 }
  0x90   :  { %v1324_v5 = vunpack.i.h.bf16 %v1322_v62  ;;  %v1323_v7 = vunpack.i.l.bf16 %v1322_v62 }
  0x91   :  { %v276_v8 = vsel %vm272_vm2, %v1294_v30, %v1318_v61  ;;  %v113_v9 = vsel %vm112_vm6, %v1358_v3, %v1359_v63 }
  0x92   :  { %v194_v10 = vsel %vm192_vm4, %v1339_v38, %v1323_v7  ;;  %v195_v11 = vsel %vm192_vm4, %v1323_v7, %v1324_v5  ;;  %493 = vmatpush.msra.mxu3 %v276_v8  ;;  %437 = vmatpush.msra.mxu0 %v113_v9 }
  0x93   :  { %455 = vmatpush.msra.mxu1 %v194_v10  ;;  %475 = vmatpush.msra.mxu2 %v195_v11 }
  0x96   :  { %v1668_v12 = vpop.permute.xlu0 %228  ;;  %v69_v39 = vpop.permute.xlu2 %68 }
  0x97   :  { %v1332_v13 = vpop.permute.xlu1 %1331  ;;  %v236_v14 = vsel %vm232_vm3, %v1309_v53, %v1668_v12 }
  0x98   :  { %v1334_v15 = vunpack.i.h.bf16 %v1332_v13  ;;  %v1333_v16 = vunpack.i.l.bf16 %v1332_v13  ;;  %494 = vmatpush.msra.mxu3 %v236_v14 }
  0x9a   :  { %v154_v17 = vsel %vm152_vm5, %v1349_v51, %v1333_v16  ;;  %v155_v18 = vsel %vm152_vm5, %v1333_v16, %v1334_v15 }
  0x9b   :  { %456 = vmatpush.msra.mxu1 %v154_v17  ;;  %476 = vmatpush.msra.mxu2 %v155_v18 }
  0x9e   :  { %v1674_v19 = vpop.permute.xlu0 %188  ;;  %v151_v35 = vpop.permute.xlu2 %150 }
  0x9f   :  { %v1342_v20 = vpop.permute.xlu1 %1341  ;;  %v196_v21 = vsel %vm192_vm4, %v1324_v5, %v1674_v19 }
  0xa0   :  { %v1344_v22 = vunpack.i.h.bf16 %v1342_v20  ;;  %v1343_v23 = vunpack.i.l.bf16 %v1342_v20  ;;  %495 = vmatpush.msra.mxu3 %v196_v21 }
  0xa2   :  { %v114_v24 = vsel %vm112_vm6, %v1359_v63, %v1343_v23  ;;  %v115_v25 = vsel %vm112_vm6, %v1343_v23, %v1344_v22  ;;  %v539_v63 = vld [vmem:[%s1975_s1] sm:$0x1f] }
  0xa3   :  { %457 = vmatpush.msra.mxu1 %v114_v24  ;;  %477 = vmatpush.msra.mxu2 %v115_v25  ;;  %v1724_v8 = vperm.slane %v539_v63, 0  ;;  %v1746_v24 = vperm.slane %v539_v63, 4 }
  0xa6   :  { %v149_v26 = vpop.permute.xlu0 %148 }
  0xa7   :  { %v1352_v27 = vpop.permute.xlu1 %1351  ;;  %v156_v28 = vsel %vm152_vm5, %v1334_v15, %v149_v26  ;;  %v1736_v15 = vperm.slane %v539_v63, 2 }
  0xa8   :  { %v1354_v30 = vunpack.i.h.bf16 %v1352_v27  ;;  %v1353_v31 = vunpack.i.l.bf16 %v1352_v27  ;;  %496 = vmatpush.msra.mxu3 %v156_v28 }
  0xaa   :  { %v75_v33 = vsel %vm72_vm7, %v1353_v31, %v1354_v30  ;;  %v76_v44 = vsel %vm72_vm7, %v1354_v30, %v69_v39 }
  0xab   :  { %478 = vmatpush.msra.mxu2 %v75_v33 }
  0xad   :  { %479 = vmatpush.msra.mxu2 %v1565_v0  ;;  %v1304_v0 = vunpack.i.h.bf16 %v1650_v47  ;;  %v157_v47 = vsel %vm152_vm5, %v149_v26, %v151_v35 }
  0xae   :  { %v109_v36 = vpop.permute.xlu0 %108  ;;  %1251 = vmatmul.msk.f32.vlgmr.msra.gmra.mxu2 %vm420_vm8, %v368_v34 }
  0xaf   :  { %v1362_v37 = vpop.permute.xlu1 %1361  ;;  %v116_v38 = vsel %vm112_vm6, %v1344_v22, %v109_v36  ;;  %v317_v53 = vsel %vm312_vm1, %v1303_v49, %v1304_v0 }
  0xb0   :  { %v1364_v41 = vunpack.i.h.bf16 %v1362_v37  ;;  %v1363_v42 = vunpack.i.l.bf16 %v1362_v37  ;;  %497 = vmatpush.msra.mxu3 %v116_v38 }
  0xb2   :  { %v73_v45 = vsel %vm72_vm7, %v1363_v42, %v1364_v41  ;;  %v74_v46 = vsel %vm72_vm7, %v1364_v41, %v1353_v31  ;;  %498 = vmatpush.msra.mxu3 %v76_v44 }
  0xb3   :  { %438 = vmatpush.msra.mxu0 %v73_v45  ;;  %458 = vmatpush.msra.mxu1 %v74_v46 }
  0xb4   :  { %499 = vmatpush.msra.mxu3 %v1570_v1  ;;  %v277_v1 = vsel %vm272_vm2, %v1318_v61, %v1319_v48 }
  0xb5   :  { %439 = vmatpush.msra.mxu0 %v1575_v2  ;;  %1252 = vmatmul.msk.f32.vlgmr.msra.gmra.mxu3 %vm420_vm8, %v368_v34 }
  0xb6   :  { %v231_v51 = vpop.permute.xlu0 %230  ;;  %459 = vmatpush.msra.mxu1 %v1582_v4  ;;  %1249 = vmatmul.msk.f32.vlgmr.msra.gmra.mxu0 %vm420_vm8, %v368_v34 }
  0xb7   :  { %511 = vmatpush.msrb.mxu0 %v357_v50  ;;  %v191_v52 = vpop.permute.xlu1 %190  ;;  %1250 = vmatmul.msk.f32.vlgmr.msra.gmra.mxu1 %vm420_vm8, %v368_v34  ;;  %v237_v2 = vsel %vm232_vm3, %v1668_v12, %v231_v51 }
  0xb8   :  { %v197_v4 = vsel %vm192_vm4, %v1674_v19, %v191_v52  ;;  %v1742_v19 = vperm.slane %v539_v63, 3 }
  0xb9   :  { %512 = vmatpush.msrb.mxu0 %v317_v53 }
  0xbb   :  { %513 = vmatpush.msrb.mxu0 %v277_v1 }
  0xbd   :  { %514 = vmatpush.msrb.mxu0 %v237_v2 }
  0xbe   :  { %v111_v40 = vpop.permute.xlu0 %110 }
  0xbf   :  { %515 = vmatpush.msrb.mxu0 %v197_v4  ;;  %v117_v49 = vsel %vm112_vm6, %v109_v36, %v111_v40  ;;  %v71_v54 = vpop.permute.xlu1 %70 }
  0xc0   :  { %v77_v55 = vsel %vm72_vm7, %v69_v39, %v71_v54 }
  0xc1   :  { %516 = vmatpush.msrb.mxu0 %v157_v47 }
  0xc3   :  { %517 = vmatpush.msrb.mxu0 %v117_v49 }
  0xc5   :  { %518 = vmatpush.msrb.mxu0 %v77_v55 }
  0xc7   :  { %519 = vmatpush.msrb.mxu0 %v1592_v6  ;;  %v1726_v6 = vperm.slane %v539_v63, 1 }
  0xc8   :  { %1253 = vmatmul.msk.f32.vlgmr.msrb.gmra.mxu0 %vm420_vm8, %v368_v34 }
  0xdf   :  { %v418_v56 = vpop.permute.xlu2 %417 }
 0x131   :  { %v481_v57 = vpop.f32.mrf.mxu2 }
 0x132   :  { %v482_v5 = vadd.f32 %v481_v57, %v418_v56 }
 0x133   :  { %v441_v58 = vpop.f32.mrf.mxu0 }
 0x134   :  { %v461_v59 = vpop.f32.mrf.mxu1  ;;  %v442_v60 = vadd.f32 %v441_v58, %v418_v56  ;;  %v531_v11 = vmul.f32 0.01, %v482_v5  ;;  %vm526_vm11 = vcmp.ge.f32.partialorder %v482_v5, 0.0  ;;  %v596_v58 = vld [vmem:[%s1976_s5] sm:$0xff]  ;;  %s1501_s5 = smov 19  }
 0x135   :  { %v462_v61 = vadd.f32 %v461_v59, %v418_v56 }
 0x136   :  { %v529_v62 = vmul.f32 0.01, %v442_v60  ;;  %vm524_vm9 = vcmp.ge.f32.partialorder %v442_v60, 0.0  ;;  %v1738_v16 = vsel %vm526_vm11, %v482_v5, %v531_v11  ;;  %v1500_v5 = vmov 0.0  }
 0x137   :  { %v530_v3 = vmul.f32 0.01, %v462_v61  ;;  %vm525_vm10 = vcmp.ge.f32.partialorder %v462_v61, 0.0  ;;  %v553_v18 = vmul.f32 %v1736_v15, %v1738_v16  ;;  %621 = vst [vmem:[#allocation3] sm:$0xff] %v1500_v5  ;;  %vm659_vm11 = vcmask 1047704  }
 0x138   :  { %v501_v7 = vpop.f32.mrf.mxu3  ;;  %v1728_v9 = vsel %vm524_vm9, %v442_v60, %v529_v62  ;;  %v598_v62 = vld [vmem:[%s1977_s6] sm:$0xff] }
 0x139   :  { %v1730_v10 = vsel %vm525_vm10, %v462_v61, %v530_v3  ;;  %v502_v12 = vadd.f32 %v501_v7, %v418_v56  ;;  %v551_v13 = vmul.f32 %v1724_v8, %v1728_v9  ;;  %vm626_vm10 = vcmask 310272  }
 0x13a   :  { %v552_v14 = vmul.f32 %v1726_v6, %v1730_v10  ;;  %627 = vst.msk [vmem:[#allocation3 + $0x28] sm:$0xff] %vm626_vm10, %v1500_v5 }
 0x13b   :  { %v532_v17 = vmul.f32 0.01, %v502_v12  ;;  %vm527_vm12 = vcmp.ge.f32.partialorder %v502_v12, 0.0 }
 0x13c   :  { %v556_v20 = vadd.f32 %v552_v14, %v551_v13 }
 0x13d   :  { %v1744_v21 = vsel %vm527_vm12, %v502_v12, %v532_v17  ;;  %vm648_vm12 = vcmask 154624  }
 0x13e   :  { %v554_v25 = vmul.f32 %v1742_v19, %v1744_v21  ;;  %v557_v26 = vadd.f32 %v556_v20, %v553_v18 }
 0x140   :  { %v558_v30 = vadd.f32 %v557_v26, %v554_v25 }
 0x145   :  { %v521_v22 = vpop.f32.mrf.mxu0 }
 0x146   :  { %v522_v23 = vadd.f32 %v521_v22, %v418_v56 }
 0x148   :  { %vm528_vm13 = vcmp.ge.f32.partialorder %v522_v23, 0.0  ;;  %v533_v27 = vmul.f32 0.01, %v522_v23 }
 0x14a   :  { %v538_v28 = vsel %vm528_vm13, %v522_v23, %v533_v27 }
 0x14b   :  { %v555_v29 = vmul.f32 %v1746_v24, %v538_v28 }
 0x14d   :  { %v559_v31 = vadd.f32 %v558_v30, %v555_v29 }
 0x14f   :  { %560 = vadd.xlane.f32.xlu0 %v559_v31 }
 0x1c2   :  { %v561_v32 = vpop.xlane.xlu0 %560 }
 0x1c3   :  { %v562_v33 = vmul.f32 0.001953125, %v561_v32 }
 0x1c5   :  { %v563_v34 = vsub.f32 %v1728_v9, %v562_v33  ;;  %v564_v36 = vsub.f32 %v1730_v10, %v562_v33  ;;  %v565_v37 = vsub.f32 %v1738_v16, %v562_v33  ;;  %v566_v38 = vsub.f32 %v1744_v21, %v562_v33 }
 0x1c6   :  { %v567_v39 = vsub.f32 %v538_v28, %v562_v33 }
 0x1c7   :  { %v568_v41 = vmul.f32 %v563_v34, %v1724_v8  ;;  %v569_v42 = vmul.f32 %v564_v36, %v1726_v6  ;;  %v570_v43 = vmul.f32 %v565_v37, %v1736_v15  ;;  %v571_v44 = vmul.f32 %v566_v38, %v1742_v19 }
 0x1c8   :  { %v572_v0 = vmul.f32 %v567_v39, %v1746_v24 }
 0x1c9   :  { %v573_v45 = vmul.f32 %v568_v41, %v568_v41  ;;  %v574_v46 = vmul.f32 %v569_v42, %v569_v42  ;;  %v575_v48 = vmul.f32 %v570_v43, %v570_v43  ;;  %v576_v51 = vmul.f32 %v571_v44, %v571_v44 }
 0x1ca   :  { %v577_v53 = vmul.f32 %v572_v0, %v572_v0 }
 0x1cb   :  { %v578_v50 = vadd.f32 %v574_v46, %v573_v45 }
 0x1cd   :  { %v579_v52 = vadd.f32 %v578_v50, %v575_v48 }
 0x1cf   :  { %v580_v1 = vadd.f32 %v579_v52, %v576_v51 }
 0x1d1   :  { %v581_v2 = vadd.f32 %v580_v1, %v577_v53 }
 0x1d3   :  { %582 = vadd.xlane.f32.xlu1 %v581_v2 }
 0x246   :  { %v583_v35 = vpop.xlane.xlu1 %582 }
 0x247   :  { %v584_v4 = vmul.f32 0.001953125, %v583_v35 }
 0x249   :  { %v585_v40 = vadd.f32 1e-05, %v584_v4 }
 0x24b   :  { %1487 = vrsqrt.f32 %v585_v40  ;;  %vm592_vm15 = vweird.f32 %v585_v40 }
 0x251   :  { %v1488_v47 = vpop.eup %1487 }
 0x252   :  { %v587_v49 = vmul.f32 %v1488_v47, %v585_v40  ;;  %vm593_vm14 = vweird.f32 %v1488_v47 }
 0x253   :  { %vm594_vm9 = vmor %vm592_vm15, %vm593_vm14 }
 0x254   :  { %v588_v54 = vmul.f32 %v1488_v47, %v587_v49 }
 0x256   :  { %v589_v55 = vmul.f32 0.5, %v588_v54 }
 0x258   :  { %v590_v56 = vsub.f32 1.5, %v589_v55 }
 0x25a   :  { %v591_v57 = vmul.f32 %v1488_v47, %v590_v56 }
 0x25c   :  { %v595_v59 = vsel %vm594_vm9, %v1488_v47, %v591_v57 }
 0x25d   :  { %v597_v60 = vmul.f32 %v596_v58, %v595_v59 }
 0x25f   :  { %603 = vperm.xlu2 %1365, %v597_v60   ;;  %v599_v61 = vmul.f32 %v597_v60, %v562_v33 }
 0x261   :  { %v600_v63 = vsub.f32 %v598_v62, %v599_v61 }
 0x267   :  { %613 = vperm.xlu2 %1365, %v600_v63  }
 0x2b9   :  { %v604_v3 = vpop.permute.xlu2 %603 }
 0x2ba   :  { %v610_v7 = vmul.f32 %v604_v3, %v538_v28  ;;  %v606_v11 = vmul.f32 %v604_v3, %v1728_v9  ;;  %v607_v20 = vmul.f32 %v604_v3, %v1730_v10  ;;  %v608_v25 = vmul.f32 %v604_v3, %v1738_v16 }
 0x2bb   :  { %v609_v27 = vmul.f32 %v604_v3, %v1744_v21 }
 0x2c1   :  { %v614_v12 = vpop.permute.xlu2 %613 }
 0x2c2   :  { %v620_v13 = vadd.f32 %v614_v12, %v610_v7  ;;  %v616_v14 = vadd.f32 %v614_v12, %v606_v11  ;;  %v617_v22 = vadd.f32 %v614_v12, %v607_v20  ;;  %v618_v26 = vadd.f32 %v614_v12, %v608_v25 }
 0x2c4   :  { %v632_v17 = vmul.f32 %v620_v13, %v1746_v24  ;;  %v628_v18 = vmul.f32 %v616_v14, %v1724_v8  ;;  %v629_v23 = vmul.f32 %v617_v22, %v1726_v6  ;;  %v630_v9 = vmul.f32 %v618_v26, %v1736_v15 }
 0x2c5   :  { %v619_v24 = vadd.f32 %v614_v12, %v609_v27 }
 0x2c6   :  { %646 = vrot.lane.b32.xlu0 %v632_v17, %s1501_s5  ;;  %638 = vrot.lane.b32.xlu2 %v628_v18, %s1501_s5 }
 0x2c7   :  { %v631_v8 = vmul.f32 %v619_v24, %v1742_v19 }
 0x2ce   :  { %640 = vrot.lane.b32.xlu2 %v629_v23, %s1501_s5 }
 0x2d6   :  { %642 = vrot.lane.b32.xlu2 %v630_v9, %s1501_s5 }
 0x2de   :  { %644 = vrot.lane.b32.xlu2 %v631_v8, %s1501_s5 }
 0x320   :  { %v639_v10 = vpop.permute.xlu2 %638 }
 0x321   :  { %660 = vst.msk [vmem:[#allocation3] sm:$0xff] %vm659_vm11, %v639_v10 }
 0x328   :  { %v641_v6 = vpop.permute.xlu2 %640  ;;  %v1788_v32 = vld [vmem:[#allocation3] sm:$0xff] }
 0x329   :  { %v1775_v28 = vsel %vm648_vm12, %v639_v10, %v641_v6 }
 0x330   :  { %v643_v16 = vpop.permute.xlu2 %642 }
 0x331   :  { %v1777_v29 = vsel %vm648_vm12, %v641_v6, %v643_v16 }
 0x332   :  { %v1366_v15 = vpack.i.bf16 %v1777_v29, %v1775_v28 }
 0x334   :  { %1367 = vrot.lane.b32.xlu1 %v1366_v15, %s1491_s25  ;;  %1372 = vrot.lane.b32.xlu2 %v1366_v15, %s1493_s12 }
 0x335   :  { %1382 = vrot.lane.b32.xlu0 %v1366_v15, %s1492_s26 }
 0x338   :  { %v647_v19 = vpop.permute.xlu0 %646  ;;  %v645_v21 = vpop.permute.xlu2 %644 }
 0x339   :  { %665 = vst.msk [vmem:[#allocation3 + $0x28] sm:$0xff] %vm648_vm12, %v647_v19  ;;  %v1784_v30 = vsel %vm648_vm12, %v643_v16, %v645_v21  ;;  %v1786_v31 = vsel %vm648_vm12, %v645_v21, %v647_v19 }
 0x33a   :  { %v1376_v33 = vpack.i.bf16 %v1788_v32, %v1784_v30 }
 0x33c   :  { %1392 = vrot.lane.b32.xlu1 %v1366_v15, %s1494_s13  ;;  %1377 = vrot.lane.b32.xlu2 %v1376_v33, %s1491_s25 }
 0x33d   :  { %1397 = vrot.lane.b32.xlu0 %v1376_v33, %s1492_s26 }
 0x340   :  { %v954_v34 = vld [vmem:[#allocation3 + $0x28] sm:$0xff] }
 0x341   :  { %v1421_v36 = vpack.i.bf16 %v954_v34, %v1786_v31 }
 0x344   :  { %1387 = vrot.lane.b32.xlu2 %v1376_v33, %s1493_s12  ;;  %1407 = vrot.lane.b32.xlu1 %v1376_v33, %s1494_s13 }
 0x345   :  { %1412 = vrot.lane.b32.xlu0 %v1366_v15, %s1496_s14 }
 0x34c   :  { %1402 = vrot.lane.b32.xlu2 %v1366_v15, %s1495_s0  ;;  %1422 = vrot.lane.b32.xlu1 %v1421_v36, %s1491_s25 }
 0x34d   :  { %1427 = vrot.lane.b32.xlu0 %v1366_v15, %s1497_s15 }
 0x354   :  { %1437 = vrot.lane.b32.xlu1 %v1421_v36, %s1493_s12  ;;  %1417 = vrot.lane.b32.xlu2 %v1376_v33, %s1495_s0 }
 0x355   :  { %1442 = vrot.lane.b32.xlu0 %v1366_v15, %s1498_s16 }
 0x35c   :  { %1452 = vrot.lane.b32.xlu1 %v1421_v36, %s1492_s26  ;;  %1432 = vrot.lane.b32.xlu2 %v1376_v33, %s1496_s14 }
 0x35d   :  { %1457 = vrot.lane.b32.xlu0 %v1376_v33, %s1498_s16 }
 0x364   :  { %1467 = vrot.lane.b32.xlu1 %v1421_v36, %s1495_s0  ;;  %1447 = vrot.lane.b32.xlu2 %v1376_v33, %s1497_s15 }
 0x365   :  { %1472 = vrot.lane.b32.xlu0 %v1421_v36, %s1496_s14 }
 0x36c   :  { %1482 = vrot.lane.b32.xlu1 %v1421_v36, %s1498_s16  ;;  %1462 = vrot.lane.b32.xlu2 %v1421_v36, %s1494_s13 }
 0x374   :  { %1477 = vrot.lane.b32.xlu2 %v1421_v36, %s1497_s15 }
 0x38e   :  { %v1373_v37 = vpop.permute.xlu2 %1372 }
 0x38f   :  { %v1375_v41 = vunpack.i.h.bf16 %v1373_v37  ;;  %v1374_v42 = vunpack.i.l.bf16 %v1373_v37 }
 0x391   :  { %v935_v47 = vsel %vm312_vm1, %v1374_v42, %v1375_v41 }
 0x396   :  { %v1814_v38 = vpop.permute.xlu2 %1377 }
 0x397   :  { %v1380_v43 = vunpack.i.h.bf16 %v1814_v38  ;;  %v1379_v46 = vunpack.i.l.bf16 %v1814_v38  ;;  %v1034_v38 = vld [vmem:[%s1978_s8] sm:$0xff] }
 0x398   :  { %1037 = vperm.xlu0 %1486, %v1034_v38  }
 0x39e   :  { %v1816_v39 = vpop.permute.xlu2 %1387 }
 0x39f   :  { %v1390_v0 = vunpack.i.h.bf16 %v1816_v39  ;;  %v1389_v52 = vunpack.i.l.bf16 %v1816_v39 }
 0x3a1   :  { %v934_v40 = vsel %vm312_vm1, %v1390_v0, %v1374_v42  ;;  %v936_v49 = vsel %vm312_vm1, %v1375_v41, %v1389_v52 }
 0x3a6   :  { %v1368_v44 = vpop.permute.xlu1 %1367  ;;  %v1403_v45 = vpop.permute.xlu2 %1402 }
 0x3a7   :  { %v1370_v48 = vunpack.i.h.bf16 %v1368_v44  ;;  %v1369_v50 = vunpack.i.l.bf16 %v1368_v44  ;;  %v1383_v51 = vpop.permute.xlu0 %1382  ;;  %v1405_v57 = vunpack.i.h.bf16 %v1403_v45  ;;  %v1404_v58 = vunpack.i.l.bf16 %v1403_v45 }
 0x3a8   :  { %v1385_v53 = vunpack.i.h.bf16 %v1383_v51  ;;  %v1384_v1 = vunpack.i.l.bf16 %v1383_v51 }
 0x3a9   :  { %v973_v2 = vsel %vm352_vm0, %v1380_v43, %v1369_v50  ;;  %v974_v35 = vsel %vm352_vm0, %v1369_v50, %v1370_v48  ;;  %v975_v4 = vsel %vm352_vm0, %v1370_v48, %v1379_v46  ;;  %v818_v11 = vsel %vm192_vm4, %v1404_v58, %v1405_v57 }
 0x3aa   :  { %1050 = vmatpush.msrb.mxu1 %v973_v2  ;;  %1070 = vmatpush.msrb.mxu2 %v974_v35  ;;  %v896_v54 = vsel %vm272_vm2, %v1384_v1, %v1385_v53  ;;  %v1890_v35 = vld [vmem:[%s1979_s7] sm:$0xff] }
 0x3ab   :  { %1090 = vmatpush.msrb.mxu3 %v975_v4 }
 0x3ac   :  { %1051 = vmatpush.msrb.mxu1 %v934_v40  ;;  %1071 = vmatpush.msrb.mxu2 %v935_v47 }
 0x3ad   :  { %1091 = vmatpush.msrb.mxu3 %v936_v49 }
 0x3ae   :  { %v1393_v55 = vpop.permute.xlu1 %1392  ;;  %v1833_v56 = vpop.permute.xlu2 %1417  ;;  %1072 = vmatpush.msrb.mxu2 %v896_v54 }
 0x3af   :  { %v1395_v59 = vunpack.i.h.bf16 %v1393_v55  ;;  %v1394_v60 = vunpack.i.l.bf16 %v1393_v55  ;;  %v1835_v61 = vpop.permute.xlu0 %1397  ;;  %v1420_v14 = vunpack.i.h.bf16 %v1833_v56  ;;  %v1419_v17 = vunpack.i.l.bf16 %v1833_v56 }
 0x3b0   :  { %v1400_v62 = vunpack.i.h.bf16 %v1835_v61  ;;  %v1399_v63 = vunpack.i.l.bf16 %v1835_v61 }
 0x3b1   :  { %v857_v3 = vsel %vm232_vm3, %v1394_v60, %v1395_v59  ;;  %v817_v10 = vsel %vm192_vm4, %v1420_v14, %v1404_v58  ;;  %v819_v6 = vsel %vm192_vm4, %v1405_v57, %v1419_v17 }
 0x3b2   :  { %v895_v5 = vsel %vm272_vm2, %v1400_v62, %v1384_v1  ;;  %1073 = vmatpush.msrb.mxu2 %v857_v3  ;;  %v897_v7 = vsel %vm272_vm2, %v1385_v53, %v1399_v63 }
 0x3b3   :  { %1052 = vmatpush.msrb.mxu1 %v895_v5  ;;  %1092 = vmatpush.msrb.mxu3 %v897_v7 }
 0x3b4   :  { %1074 = vmatpush.msrb.mxu2 %v818_v11 }
 0x3b6   :  { %v1845_v12 = vpop.permute.xlu1 %1407  ;;  %v1847_v13 = vpop.permute.xlu2 %1432 }
 0x3b7   :  { %v1413_v18 = vpop.permute.xlu0 %1412  ;;  %v1410_v20 = vunpack.i.h.bf16 %v1845_v12  ;;  %v1409_v22 = vunpack.i.l.bf16 %v1845_v12  ;;  %v1435_v26 = vunpack.i.h.bf16 %v1847_v13  ;;  %v1434_v9 = vunpack.i.l.bf16 %v1847_v13 }
 0x3b8   :  { %v1415_v23 = vunpack.i.h.bf16 %v1413_v18  ;;  %v1414_v25 = vunpack.i.l.bf16 %v1413_v18 }
 0x3b9   :  { %v856_v27 = vsel %vm232_vm3, %v1410_v20, %v1394_v60  ;;  %v858_v24 = vsel %vm232_vm3, %v1395_v59, %v1409_v22 }
 0x3ba   :  { %1053 = vmatpush.msrb.mxu1 %v856_v27  ;;  %v779_v8 = vsel %vm152_vm5, %v1414_v25, %v1415_v23  ;;  %1093 = vmatpush.msrb.mxu3 %v858_v24  ;;  %v778_v16 = vsel %vm152_vm5, %v1435_v26, %v1414_v25  ;;  %v780_v15 = vsel %vm152_vm5, %v1415_v23, %v1434_v9 }
 0x3bb   :  { %1075 = vmatpush.msrb.mxu2 %v779_v8 }
 0x3bc   :  { %1054 = vmatpush.msrb.mxu1 %v817_v10  ;;  %1094 = vmatpush.msrb.mxu3 %v819_v6 }
 0x3be   :  { %v1423_v19 = vpop.permute.xlu1 %1422  ;;  %v1868_v21 = vpop.permute.xlu2 %1447  ;;  %1055 = vmatpush.msrb.mxu1 %v778_v16  ;;  %1095 = vmatpush.msrb.mxu3 %v780_v15 }
 0x3bf   :  { %v1428_v33 = vpop.permute.xlu0 %1427  ;;  %v1424_v34 = vunpack.i.l.bf16 %v1423_v19  ;;  %v1450_v36 = vunpack.i.h.bf16 %v1868_v21  ;;  %v1449_v37 = vunpack.i.l.bf16 %v1868_v21  ;;  %v1425_v55 = vunpack.i.h.bf16 %v1423_v19 }
 0x3c0   :  { %v1430_v41 = vunpack.i.h.bf16 %v1428_v33  ;;  %v1429_v42 = vunpack.i.l.bf16 %v1428_v33 }
 0x3c1   :  { %v976_v43 = vsel %vm352_vm0, %v1379_v46, %v1424_v34  ;;  %v977_v61 = vsel %vm352_vm0, %v1424_v34, %v1425_v55 }
 0x3c2   :  { %v739_v44 = vsel %vm112_vm6, %v1450_v36, %v1429_v42  ;;  %v740_v45 = vsel %vm112_vm6, %v1429_v42, %v1430_v41  ;;  %v741_v0 = vsel %vm112_vm6, %v1430_v41, %v1449_v37  ;;  %1110 = vmatpush.msra.mxu0 %v976_v43  ;;  %v1158_v36 = vld [vmem:[%s1980_s2] sm:$0x1f] }
 0x3c3   :  { %1056 = vmatpush.msrb.mxu1 %v739_v44  ;;  %1076 = vmatpush.msrb.mxu2 %v740_v45  ;;  %v1160_v42 = vperm.slane %v1158_v36, 0 }
 0x3c4   :  { %1096 = vmatpush.msrb.mxu3 %v741_v0 }
 0x3c6   :  { %v1438_v48 = vpop.permute.xlu1 %1437  ;;  %v1463_v4 = vpop.permute.xlu2 %1462 }
 0x3c7   :  { %v1443_v50 = vpop.permute.xlu0 %1442  ;;  %v1439_v51 = vunpack.i.l.bf16 %v1438_v48  ;;  %v1464_v47 = vunpack.i.l.bf16 %v1463_v4  ;;  %v1465_v5 = vunpack.i.h.bf16 %v1463_v4 }
 0x3c8   :  { %v1445_v46 = vunpack.i.h.bf16 %v1443_v50  ;;  %v1444_v53 = vunpack.i.l.bf16 %v1443_v50  ;;  %v1162_v50 = vperm.slane %v1158_v36, 2 }
 0x3c9   :  { %v937_v1 = vsel %vm312_vm1, %v1389_v52, %v1439_v51  ;;  %v859_v60 = vsel %vm232_vm3, %v1409_v22, %v1464_v47  ;;  %v860_v23 = vsel %vm232_vm3, %v1464_v47, %v1465_v5  ;;  %v1164_v47 = vperm.slane %v1158_v36, 4 }
 0x3ca   :  { %v701_v2 = vsel %vm72_vm7, %v1444_v53, %v1445_v46  ;;  %1111 = vmatpush.msra.mxu0 %v937_v1 }
 0x3cb   :  { %1077 = vmatpush.msrb.mxu2 %v701_v2  ;;  %v1163_v2 = vperm.slane %v1158_v36, 3 }
 0x3cd   :  { %1078 = vmatpush.msrb.mxu2 %v1775_v28  ;;  %v1440_v28 = vunpack.i.h.bf16 %v1438_v48 }
 0x3ce   :  { %v1453_v40 = vpop.permute.xlu1 %1452  ;;  %1255 = vmatmul.msk.f32.vlgmr.msrb.gmra.mxu2 %vm420_vm8, %v1890_v35 }
 0x3cf   :  { %v1454_v39 = vunpack.i.l.bf16 %v1453_v40  ;;  %v1458_v49 = vpop.permute.xlu0 %1457  ;;  %v1455_v62 = vunpack.i.h.bf16 %v1453_v40  ;;  %v938_v12 = vsel %vm312_vm1, %v1439_v51, %v1440_v28 }
 0x3d0   :  { %v1460_v52 = vunpack.i.h.bf16 %v1458_v49  ;;  %v1459_v54 = vunpack.i.l.bf16 %v1458_v49 }
 0x3d1   :  { %v898_v57 = vsel %vm272_vm2, %v1399_v63, %v1454_v39  ;;  %v1478_v63 = vpop.permute.xlu2 %1477  ;;  %v899_v18 = vsel %vm272_vm2, %v1454_v39, %v1455_v62 }
 0x3d2   :  { %v700_v58 = vsel %vm72_vm7, %v1460_v52, %v1444_v53  ;;  %v702_v59 = vsel %vm72_vm7, %v1445_v46, %v1459_v54  ;;  %1112 = vmatpush.msra.mxu0 %v898_v57  ;;  %v1480_v26 = vunpack.i.h.bf16 %v1478_v63 }
 0x3d3   :  { %1057 = vmatpush.msrb.mxu1 %v700_v58  ;;  %1097 = vmatpush.msrb.mxu3 %v702_v59 }
 0x3d4   :  { %1113 = vmatpush.msra.mxu0 %v859_v60 }
 0x3d5   :  { %1058 = vmatpush.msrb.mxu1 %v1788_v32  ;;  %1098 = vmatpush.msrb.mxu3 %v1777_v29  ;;  %v1479_v32 = vunpack.i.l.bf16 %v1478_v63 }
 0x3d6   :  { %v1468_v3 = vpop.permute.xlu1 %1467  ;;  %1256 = vmatmul.msk.f32.vlgmr.msrb.gmra.mxu3 %vm420_vm8, %v1890_v35  ;;  %1254 = vmatmul.msk.f32.vlgmr.msrb.gmra.mxu1 %vm420_vm8, %v1890_v35 }
 0x3d7   :  { %1130 = vmatpush.msra.mxu1 %v977_v61  ;;  %v1469_v7 = vunpack.i.l.bf16 %v1468_v3  ;;  %v1473_v11 = vpop.permute.xlu0 %1472  ;;  %v1470_v29 = vunpack.i.h.bf16 %v1468_v3  ;;  %v742_v56 = vsel %vm112_vm6, %v1449_v37, %v1479_v32  ;;  %v743_v13 = vsel %vm112_vm6, %v1479_v32, %v1480_v26 }
 0x3d8   :  { %v1474_v14 = vunpack.i.l.bf16 %v1473_v11  ;;  %v1475_v22 = vunpack.i.h.bf16 %v1473_v11 }
 0x3d9   :  { %1131 = vmatpush.msra.mxu1 %v938_v12  ;;  %v820_v20 = vsel %vm192_vm4, %v1419_v17, %v1469_v7  ;;  %v821_v27 = vsel %vm192_vm4, %v1469_v7, %v1470_v29 }
 0x3da   :  { %1114 = vmatpush.msra.mxu0 %v820_v20  ;;  %v781_v25 = vsel %vm152_vm5, %v1434_v9, %v1474_v14  ;;  %v782_v10 = vsel %vm152_vm5, %v1474_v14, %v1475_v22 }
 0x3db   :  { %1132 = vmatpush.msra.mxu1 %v899_v18 }
 0x3dc   :  { %1115 = vmatpush.msra.mxu0 %v781_v25 }
 0x3dd   :  { %1133 = vmatpush.msra.mxu1 %v860_v23 }
 0x3de   :  { %v1483_v17 = vpop.permute.xlu1 %1482  ;;  %1116 = vmatpush.msra.mxu0 %v742_v56 }
 0x3df   :  { %1134 = vmatpush.msra.mxu1 %v821_v27  ;;  %v1485_v24 = vunpack.i.h.bf16 %v1483_v17  ;;  %v1484_v8 = vunpack.i.l.bf16 %v1483_v17 }
 0x3e1   :  { %1135 = vmatpush.msra.mxu1 %v782_v10  ;;  %v703_v9 = vsel %vm72_vm7, %v1459_v54, %v1484_v8  ;;  %v704_v6 = vsel %vm72_vm7, %v1484_v8, %v1485_v24 }
 0x3e2   :  { %1117 = vmatpush.msra.mxu0 %v703_v9 }
 0x3e3   :  { %1136 = vmatpush.msra.mxu1 %v743_v13 }
 0x3e4   :  { %1118 = vmatpush.msra.mxu0 %v1784_v30 }
 0x3e5   :  { %1137 = vmatpush.msra.mxu1 %v704_v6  ;;  %1257 = vmatmul.msk.f32.vlgmr.msra.gmra.mxu0 %vm420_vm8, %v1890_v35 }
 0x3e7   :  { %1138 = vmatpush.msra.mxu1 %v1786_v31  ;;  %v1161_v31 = vperm.slane %v1158_v36, 1  ;;  %v1217_v36 = vld [vmem:[%s1982_s10] sm:$0xff] }
 0x3e8   :  { %1258 = vmatmul.msk.f32.vlgmr.msra.gmra.mxu1 %vm420_vm8, %v1890_v35 }
 0x40a   :  { %v1038_v16 = vpop.permute.xlu0 %1037 }
 0x451   :  { %v1080_v15 = vpop.f32.mrf.mxu2 }
 0x452   :  { %v1081_v33 = vadd.f32 %v1080_v15, %v1038_v16 }
 0x453   :  { %v1060_v19 = vpop.f32.mrf.mxu1 }
 0x454   :  { %v1061_v21 = vadd.f32 %v1060_v19, %v1038_v16  ;;  %v1149_v37 = vmul.f32 0.01, %v1081_v33  ;;  %vm1144_vm1 = vcmp.ge.f32.partialorder %v1081_v33, 0.0  ;;  %v1215_v19 = vld [vmem:[%s1981_s9] sm:$0xff] }
 0x456   :  { %v1148_v34 = vmul.f32 0.01, %v1061_v21  ;;  %vm1143_vm0 = vcmp.ge.f32.partialorder %v1061_v21, 0.0  ;;  %v1938_v44 = vsel %vm1144_vm1, %v1081_v33, %v1149_v37 }
 0x457   :  { %v1171_v48 = vmul.f32 %v1161_v31, %v1938_v44 }
 0x458   :  { %v1936_v43 = vsel %vm1143_vm0, %v1061_v21, %v1148_v34 }
 0x459   :  { %v1100_v30 = vpop.f32.mrf.mxu3  ;;  %v1170_v0 = vmul.f32 %v1160_v42, %v1936_v43 }
 0x45a   :  { %v1101_v41 = vadd.f32 %v1100_v30, %v1038_v16 }
 0x45b   :  { %v1175_v35 = vadd.f32 %v1171_v48, %v1170_v0 }
 0x45c   :  { %v1150_v45 = vmul.f32 0.01, %v1101_v41  ;;  %vm1145_vm2 = vcmp.ge.f32.partialorder %v1101_v41, 0.0 }
 0x45e   :  { %v1942_v51 = vsel %vm1145_vm2, %v1101_v41, %v1150_v45 }
 0x45f   :  { %v1172_v53 = vmul.f32 %v1162_v50, %v1942_v51 }
 0x461   :  { %v1176_v54 = vadd.f32 %v1175_v35, %v1172_v53 }
 0x462   :  { %v1120_v38 = vpop.f32.mrf.mxu0 }
 0x463   :  { %v1121_v46 = vadd.f32 %v1120_v38, %v1038_v16 }
 0x465   :  { %v1140_v1 = vpop.f32.mrf.mxu1  ;;  %vm1146_vm3 = vcmp.ge.f32.partialorder %v1121_v46, 0.0  ;;  %v1151_v4 = vmul.f32 0.01, %v1121_v46 }
 0x466   :  { %v1141_v40 = vadd.f32 %v1140_v1, %v1038_v16 }
 0x467   :  { %v1156_v39 = vsel %vm1146_vm3, %v1121_v46, %v1151_v4 }
 0x468   :  { %vm1147_vm4 = vcmp.ge.f32.partialorder %v1141_v40, 0.0  ;;  %v1152_v49 = vmul.f32 0.01, %v1141_v40  ;;  %v1173_v52 = vmul.f32 %v1163_v2, %v1156_v39 }
 0x46a   :  { %v1157_v55 = vsel %vm1147_vm4, %v1141_v40, %v1152_v49  ;;  %v1177_v58 = vadd.f32 %v1176_v54, %v1173_v52 }
 0x46b   :  { %v1174_v57 = vmul.f32 %v1164_v47, %v1157_v55 }
 0x46d   :  { %v1178_v59 = vadd.f32 %v1177_v58, %v1174_v57 }
 0x46f   :  { %1179 = vadd.xlane.f32.xlu2 %v1178_v59 }
 0x4e2   :  { %v1180_v28 = vpop.xlane.xlu2 %1179 }
 0x4e3   :  { %v1181_v60 = vmul.f32 0.001953125, %v1180_v28 }
 0x4e5   :  { %v1182_v62 = vsub.f32 %v1936_v43, %v1181_v60  ;;  %v1183_v61 = vsub.f32 %v1938_v44, %v1181_v60  ;;  %v1184_v63 = vsub.f32 %v1942_v51, %v1181_v60  ;;  %v1185_v3 = vsub.f32 %v1156_v39, %v1181_v60 }
 0x4e6   :  { %v1186_v5 = vsub.f32 %v1157_v55, %v1181_v60 }
 0x4e7   :  { %v1187_v7 = vmul.f32 %v1182_v62, %v1160_v42  ;;  %v1188_v11 = vmul.f32 %v1183_v61, %v1161_v31  ;;  %v1189_v12 = vmul.f32 %v1184_v63, %v1162_v50  ;;  %v1190_v14 = vmul.f32 %v1185_v3, %v1163_v2 }
 0x4e8   :  { %v1191_v18 = vmul.f32 %v1186_v5, %v1164_v47 }
 0x4e9   :  { %v1192_v32 = vmul.f32 %v1187_v7, %v1187_v7  ;;  %v1193_v29 = vmul.f32 %v1188_v11, %v1188_v11  ;;  %v1194_v20 = vmul.f32 %v1189_v12, %v1189_v12  ;;  %v1195_v23 = vmul.f32 %v1190_v14, %v1190_v14 }
 0x4ea   :  { %v1196_v26 = vmul.f32 %v1191_v18, %v1191_v18 }
 0x4eb   :  { %v1197_v22 = vadd.f32 %v1193_v29, %v1192_v32 }
 0x4ed   :  { %v1198_v25 = vadd.f32 %v1197_v22, %v1194_v20 }
 0x4ef   :  { %v1199_v27 = vadd.f32 %v1198_v25, %v1195_v23 }
 0x4f1   :  { %v1200_v56 = vadd.f32 %v1199_v27, %v1196_v26 }
 0x4f3   :  { %1201 = vadd.xlane.f32.xlu1 %v1200_v56 }
 0x566   :  { %v1202_v17 = vpop.xlane.xlu1 %1201 }
 0x567   :  { %v1203_v24 = vmul.f32 0.001953125, %v1202_v17 }
 0x569   :  { %v1204_v8 = vadd.f32 1e-05, %v1203_v24 }
 0x56b   :  { %1489 = vrsqrt.f32 %v1204_v8  ;;  %vm1211_vm6 = vweird.f32 %v1204_v8 }
 0x571   :  { %v1490_v10 = vpop.eup %1489 }
 0x572   :  { %v1206_v13 = vmul.f32 %v1490_v10, %v1204_v8  ;;  %vm1212_vm5 = vweird.f32 %v1490_v10 }
 0x573   :  { %vm1213_vm7 = vmor %vm1211_vm6, %vm1212_vm5 }
 0x574   :  { %v1207_v9 = vmul.f32 %v1490_v10, %v1206_v13 }
 0x576   :  { %v1208_v6 = vmul.f32 0.5, %v1207_v9 }
 0x578   :  { %v1209_v16 = vsub.f32 1.5, %v1208_v6 }
 0x57a   :  { %v1210_v15 = vmul.f32 %v1490_v10, %v1209_v16 }
 0x57c   :  { %v1214_v21 = vsel %vm1213_vm7, %v1490_v10, %v1210_v15 }
 0x57d   :  { %v1216_v33 = vmul.f32 %v1215_v19, %v1214_v21 }
 0x57f   :  { %1222 = vperm.xlu0 %1486, %v1216_v33   ;;  %v1218_v34 = vmul.f32 %v1216_v33, %v1181_v60 }
 0x581   :  { %v1219_v37 = vsub.f32 %v1217_v36, %v1218_v34 }
 0x587   :  { %1232 = vperm.xlu0 %1486, %v1219_v37  }
 0x5f1   :  { %v1223_v30 = vpop.permute.xlu0 %1222 }
 0x5f2   :  { %v1225_v41 = vmul.f32 %v1223_v30, %v1936_v43  ;;  %v1226_v42 = vmul.f32 %v1223_v30, %v1938_v44  ;;  %v1227_v31 = vmul.f32 %v1223_v30, %v1942_v51  ;;  %v1228_v45 = vmul.f32 %v1223_v30, %v1156_v39 }
 0x5f3   :  { %v1229_v48 = vmul.f32 %v1223_v30, %v1157_v55 }
 0x5f9   :  { %v1233_v0 = vpop.permute.xlu0 %1232 }
 0x5fa   :  { %v1235_v50 = vadd.f32 %v1233_v0, %v1225_v41  ;;  %v1236_v38 = vadd.f32 %v1233_v0, %v1226_v42  ;;  %v1237_v46 = vadd.f32 %v1233_v0, %v1227_v31  ;;  %v1238_v53 = vadd.f32 %v1233_v0, %v1228_v45 }
 0x5fb   :  { %v1239_v1 = vadd.f32 %v1233_v0, %v1229_v48 }
 0x5fc   :  { %1240 = vst [vmem:[%s1983_s11] sm:$0xff] %v1235_v50 }
 0x5fd   :  { %1241 = vst [vmem:[%s1983_s11 + $0x8] sm:$0xff] %v1236_v38 }
 0x5fe   :  { %1242 = vst [vmem:[%s1983_s11 + $0x10] sm:$0xff] %v1237_v46 }
 0x5ff   :  { %1243 = vst [vmem:[%s1983_s11 + $0x18] sm:$0xff] %v1238_v53 }
 0x600   :  { %1244 = vst [vmem:[%s1983_s11 + $0x20] sm:$0xff] %v1239_v1 }

</bundles_post_ra>
